<compile_context>
chip_gen: v7x
topology: tpu7x:2x2x1
jax: 0.10.0
libtpu: 0.0.40
codegen_flags: <defaults>
</compile_context>

<pallas_src>
import math

import jax
import jax.numpy as jnp
from jax.experimental import pallas as pl
from jax.experimental.pallas import tpu as pltpu


# ----------------------------------------------------------------------------
# helpers
# ----------------------------------------------------------------------------
def _round_up(x: int, m: int) -> int:
    return ((x + m - 1) // m) * m


# ----------------------------------------------------------------------------
# Tiled GEMM kernel:  out = activation(A @ W (+ bias))
# ----------------------------------------------------------------------------
def _apply_activation(acc, activation):
    if activation == "leaky_relu":
        return jnp.maximum(acc, 0.2 * acc)
    if activation == "sigmoid":
        return jax.nn.sigmoid(acc)
    return acc


def _make_gemm_kernel(has_bias: bool, activation):
    if has_bias:
        def kernel(a_ref, w_ref, b_ref, o_ref, acc_ref):
            k = pl.program_id(2)

            @pl.when(k == 0)
            def _():
                acc_ref[...] = jnp.zeros_like(acc_ref)

            acc_ref[...] += jnp.dot(a_ref[...], w_ref[...],
                                    preferred_element_type=jnp.float32)

            @pl.when(k == pl.num_programs(2) - 1)
            def _():
                acc = acc_ref[...] + b_ref[...]
                o_ref[...] = _apply_activation(acc, activation).astype(o_ref.dtype)
    else:
        def kernel(a_ref, w_ref, o_ref, acc_ref):
            k = pl.program_id(2)

            @pl.when(k == 0)
            def _():
                acc_ref[...] = jnp.zeros_like(acc_ref)

            acc_ref[...] += jnp.dot(a_ref[...], w_ref[...],
                                    preferred_element_type=jnp.float32)

            @pl.when(k == pl.num_programs(2) - 1)
            def _():
                o_ref[...] = _apply_activation(acc_ref[...],
                                               activation).astype(o_ref.dtype)
    return kernel


def pallas_gemm(a, w, bias=None, activation=None,
                tm_cap=256, tn_cap=256, tk_cap=512):
    """a: [M, K] f32, w: [K, N] f32.  Returns activation(a @ w + bias) [M, N]."""
    M, K = a.shape
    Kw, N = w.shape
    assert K == Kw

    tm = min(tm_cap, _round_up(M, 16))      # bf16 sublane granularity
    Mp = _round_up(M, tm)
    tn = min(tn_cap, _round_up(N, 128))     # lane-dense output
    Np = _round_up(N, tn)
    tk = min(tk_cap, _round_up(K, 128))
    Kp = _round_up(K, tk)

    a_p = jnp.pad(a.astype(jnp.bfloat16), ((0, Mp - M), (0, Kp - K)))
    w_p = jnp.pad(w.astype(jnp.bfloat16), ((0, Kp - K), (0, Np - N)))

    in_specs = [pl.BlockSpec((tm, tk), lambda i, j, k: (i, k)),
                pl.BlockSpec((tk, tn), lambda i, j, k: (k, j))]
    args = [a_p, w_p]
    has_bias = bias is not None
    if has_bias:
        b_p = jnp.pad(bias.astype(jnp.float32).reshape(1, N),
                      ((0, 0), (0, Np - N)))
        in_specs.append(pl.BlockSpec((1, tn), lambda i, j, k: (0, j)))
        args.append(b_p)

    out = pl.pallas_call(
        _make_gemm_kernel(has_bias, activation),
        out_shape=jax.ShapeDtypeStruct((Mp, Np), jnp.float32),
        grid_spec=pltpu.PrefetchScalarGridSpec(
            num_scalar_prefetch=0,
            grid=(Mp // tm, Np // tn, Kp // tk),
            in_specs=in_specs,
            out_specs=pl.BlockSpec((tm, tn), lambda i, j, k: (i, j)),
            scratch_shapes=[pltpu.VMEM((tm, tn), jnp.float32)]),
        compiler_params=pltpu.CompilerParams(
            dimension_semantics=("parallel", "parallel", "arbitrary")),
    )(*args)
    return out[:M, :N]


# ----------------------------------------------------------------------------
# Tiled BatchNorm-apply + LeakyReLU kernel (pass 2 of two-pass BN)
# ----------------------------------------------------------------------------
def _bn_leaky_kernel(x_ref, s_ref, b_ref, o_ref):
    y = x_ref[...] * s_ref[...] + b_ref[...]
    o_ref[...] = jnp.maximum(y, 0.2 * y).astype(o_ref.dtype)


def pallas_bn_leaky(x, scale, shift, tm_cap=512, tn_cap=512):
    """x: [M, N] f32; per-channel scale/shift: [N]. Returns lrelu(x*scale+shift)."""
    M, N = x.shape
    tm = min(tm_cap, _round_up(M, 8))
    Mp = _round_up(M, tm)
    tn = min(tn_cap, _round_up(N, 128))
    Np = _round_up(N, tn)

    x_p = jnp.pad(x, ((0, Mp - M), (0, Np - N)))
    s_p = jnp.pad(scale.reshape(1, N), ((0, 0), (0, Np - N)))
    b_p = jnp.pad(shift.reshape(1, N), ((0, 0), (0, Np - N)))

    out = pl.pallas_call(
        _bn_leaky_kernel,
        out_shape=jax.ShapeDtypeStruct((Mp, Np), jnp.float32),
        grid_spec=pltpu.PrefetchScalarGridSpec(
            num_scalar_prefetch=0,
            grid=(Mp // tm, Np // tn),
            in_specs=[pl.BlockSpec((tm, tn), lambda i, j: (i, j)),
                      pl.BlockSpec((1, tn), lambda i, j: (0, j)),
                      pl.BlockSpec((1, tn), lambda i, j: (0, j))],
            out_specs=pl.BlockSpec((tm, tn), lambda i, j: (i, j))),
        compiler_params=pltpu.CompilerParams(
            dimension_semantics=("parallel", "parallel")),
    )(x_p, s_p, b_p)
    return out[:M, :N]


# ----------------------------------------------------------------------------
# Batched tiled GEMM with a per-batch broadcast add (concat-free xz1 layer)
#   out[b] = leaky_relu(a[b] @ W  +  zadd[b])
# ----------------------------------------------------------------------------
def _gemm_zadd_kernel(a_ref, w_ref, z_ref, o_ref, acc_ref):
    k = pl.program_id(3)

    @pl.when(k == 0)
    def _():
        acc_ref[...] = jnp.zeros_like(acc_ref)

    acc_ref[...] += jnp.dot(a_ref[0], w_ref[...],
                            preferred_element_type=jnp.float32)

    @pl.when(k == pl.num_programs(3) - 1)
    def _():
        y = acc_ref[...] + z_ref[0]          # (tm,tn) + (1,tn) broadcast
        o_ref[0] = jnp.maximum(y, 0.2 * y).astype(o_ref.dtype)


def pallas_gemm_batched_zadd(a3, w, zadd, tm_cap=256, tn_cap=256, tk_cap=512):
    """a3: [B, HW, K] f32, w: [K, N] f32, zadd: [B, N] f32."""
    B, HW, K = a3.shape
    Kw, N = w.shape
    assert K == Kw and zadd.shape == (B, N)

    tm = min(tm_cap, _round_up(HW, 16))
    HWp = _round_up(HW, tm)
    tn = min(tn_cap, _round_up(N, 128))
    Np = _round_up(N, tn)
    tk = min(tk_cap, _round_up(K, 128))
    Kp = _round_up(K, tk)

    a_p = jnp.pad(a3.astype(jnp.bfloat16),
                  ((0, 0), (0, HWp - HW), (0, Kp - K)))
    w_p = jnp.pad(w.astype(jnp.bfloat16), ((0, Kp - K), (0, Np - N)))
    z_p = jnp.pad(zadd.astype(jnp.float32).reshape(B, 1, N),
                  ((0, 0), (0, 0), (0, Np - N)))

    out = pl.pallas_call(
        _gemm_zadd_kernel,
        out_shape=jax.ShapeDtypeStruct((B, HWp, Np), jnp.float32),
        grid_spec=pltpu.PrefetchScalarGridSpec(
            num_scalar_prefetch=0,
            grid=(B, HWp // tm, Np // tn, Kp // tk),
            in_specs=[pl.BlockSpec((1, tm, tk), lambda b, i, j, k: (b, i, k)),
                      pl.BlockSpec((tk, tn), lambda b, i, j, k: (k, j)),
                      pl.BlockSpec((1, 1, tn), lambda b, i, j, k: (b, 0, j))],
            out_specs=pl.BlockSpec((1, tm, tn), lambda b, i, j, k: (b, i, j)),
            scratch_shapes=[pltpu.VMEM((tm, tn), jnp.float32)]),
        compiler_params=pltpu.CompilerParams(
            dimension_semantics=("parallel", "parallel", "parallel",
                                 "arbitrary")),
    )(a_p, w_p, z_p)
    return out[:, :HW, :N]


# ----------------------------------------------------------------------------
# Glue: im2col (NHWC, static strided slices), parameters, forward pass
# ----------------------------------------------------------------------------
def im2col_nhwc(x, k, stride, pad):
    """x: [B, H, W, C] -> ([B*OH*OW, k*k*C], OH, OW); column order (kh, kw, c)."""
    B, H, W, C = x.shape
    xp = jnp.pad(x, ((0, 0), (pad, pad), (pad, pad), (0, 0)))
    OH = (H + 2 * pad - k) // stride + 1
    OW = (W + 2 * pad - k) // stride + 1
    cols = []
    for kh in range(k):
        for kw in range(k):
            cols.append(xp[:, kh:kh + stride * OH:stride,
                           kw:kw + stride * OW:stride, :])
    patches = jnp.stack(cols, axis=3)                # [B, OH, OW, k*k, C]
    return patches.reshape(B * OH * OW, k * k * C), OH, OW


def init_params(key, z_dim, input_channels, image_size, feature_maps):
    num_layers = max(3, min(int(math.log2(image_size)) - 2, 5))
    feature_dim = feature_maps * 2 ** (num_layers - 1)
    kit = iter(jax.random.split(key, 64))

    def nrm(shape, s=0.1):
        return s * jax.random.normal(next(kit), shape, jnp.float32)

    params = {"x_layers": [], "num_layers": num_layers,
              "feature_dim": feature_dim}
    cur = input_channels
    for i in range(num_layers):
        out = feature_maps * 2 ** i
        params["x_layers"].append({
            "w": nrm((out, cur, 4, 4)), "bias": None,              # bias=False
            "use_bn": i > 0,
            "gamma": jnp.ones((out,), jnp.float32) if i > 0 else None,
            "beta": jnp.zeros((out,), jnp.float32) if i > 0 else None,
            "k": 4, "s": 2, "p": 1,
        })
        cur = out
    params["x_layers"].append({
        "w": nrm((feature_dim, cur, 3, 3)), "bias": nrm((feature_dim,)),
        "use_bn": True,
        "gamma": jnp.ones((feature_dim,), jnp.float32),
        "beta": jnp.zeros((feature_dim,), jnp.float32),
        "k": 3, "s": 1, "p": 1,
    })
    # zStack (1x1 convs stored as [K, N] matrices)
    params["z1_w"] = nrm((z_dim, feature_dim // 2))
    params["z2_w"] = nrm((feature_dim // 2, feature_dim))
    params["z2_b"] = nrm((feature_dim,))
    # xzStack (1x1 convs)
    params["xz1_w"] = nrm((2 * feature_dim, 2 * feature_dim))
    params["xz2_w"] = nrm((2 * feature_dim, feature_dim))
    params["xz3_w"] = nrm((feature_dim, feature_dim))
    params["xz3_b"] = nrm((feature_dim,))
    # final 1x1 conv
    params["f_w"] = nrm((feature_dim, 1))
    params["f_b"] = nrm((1,))
    return params


def discriminator_forward(params, x, z, eps=1e-5):
    B = x.shape[0]
    fd = params["feature_dim"]

    # ---- x_graph: strided 4x4 convs + final 3x3 conv, NHWC throughout ----
    h = x.transpose(0, 2, 3, 1)                       # NCHW -> NHWC once
    OH = OW = None
    for layer in params["x_layers"]:
        w = layer["w"]                                # [Cout, Cin, kh, kw]
        cout = w.shape[0]
        a, OH, OW = im2col_nhwc(h, layer["k"], layer["s"], layer["p"])
        wmat = w.transpose(2, 3, 1, 0).reshape(-1, cout)   # (kh,kw,cin) x cout
        if layer["use_bn"]:
            # pass 1: tiled GEMM (+conv bias), no activation
            y = pallas_gemm(a, wmat, bias=layer["bias"], activation=None)
            # training-mode BN stats over (N,H,W) == GEMM row axis
            mean = jnp.mean(y, axis=0)
            var = jnp.mean(jnp.square(y - mean), axis=0)
            scale = layer["gamma"] * jax.lax.rsqrt(var + eps)
            shift = layer["beta"] - mean * scale
            # pass 2: fused BN-apply + LeakyReLU
            rows = pallas_bn_leaky(y, scale, shift)
        else:
            rows = pallas_gemm(a, wmat, bias=layer["bias"],
                               activation="leaky_relu")
        h = rows.reshape(B, OH, OW, cout)             # stays NHWC
    HW = OH * OW
    x_rows = h.reshape(B, HW, fd)

    # ---- z_graph: two 1x1 convs on [B, z_dim, 1, 1] ----
    z_rows = z.reshape(B, -1)
    zf = pallas_gemm(z_rows, params["z1_w"], activation="leaky_relu")
    zf = pallas_gemm(zf, params["z2_w"], bias=params["z2_b"],
                     activation="leaky_relu")         # [B, fd]
    # bilinear upsample 1x1 -> OHxOW (align_corners=False) == per-batch bcast

    # ---- xz_graph: concat-free xz1 = x_rows @ Wx + bcast(zf @ Wz), then 1x1s ----
    Wx = params["xz1_w"][:fd]                         # [fd, 2fd]
    Wz = params["xz1_w"][fd:]                         # [fd, 2fd]
    zterm = pallas_gemm(zf, Wz, activation=None)      # [B, 2fd]
    hxz = pallas_gemm_batched_zadd(x_rows, Wx, zterm)  # [B, HW, 2fd], LReLU fused
    hxz = hxz.reshape(B * HW, 2 * fd)
    hxz = pallas_gemm(hxz, params["xz2_w"], activation="leaky_relu")
    hxz = pallas_gemm(hxz, params["xz3_w"], bias=params["xz3_b"],
                      activation="leaky_relu")        # [B*HW, fd]

    # ---- final: pool over HW, then 1x1 conv (dot) + bias + sigmoid ----
    # (adaptive_avg_pool2d commutes with the linear 1x1 conv)
    pooled = jnp.mean(hxz.reshape(B, HW, fd), axis=1)  # [B, fd]
    out = pallas_gemm(pooled, params["f_w"], bias=params["f_b"],
                      activation="sigmoid")            # [B, 1]
    return out


if __name__ == "__main__":
    key = jax.random.PRNGKey(0)
    kp, kx, kz = jax.random.split(key, 3)

    B, C_IN, IMG, Z_DIM, FM = 2, 3, 16, 8, 8
    params = init_params(kp, z_dim=Z_DIM, input_channels=C_IN,
                         image_size=IMG, feature_maps=FM)
    x = jax.random.normal(kx, (B, C_IN, IMG, IMG), jnp.float32)
    z = jax.random.normal(kz, (B, Z_DIM, 1, 1), jnp.float32)

    fwd = jax.jit(lambda xx, zz: discriminator_forward(params, xx, zz))
    out = jax.block_until_ready(fwd(x, z))

    assert out.shape == (B, 1), out.shape
    assert bool(jnp.all(jnp.isfinite(out)))
    assert bool(jnp.all((out >= 0.0) & (out <= 1.0)))
    print("KERNEL_OK")
</pallas_src>

<mosaic_0001>
module attributes {stable_mosaic.version = 11 : i64} {
  func.func @kernel(%arg0: i32, %arg1: i32, %arg2: i32, %arg3: memref<128x128xbf16, #tpu.memory_space<vmem>>, %arg4: memref<128x128xbf16, #tpu.memory_space<vmem>>, %arg5: memref<128x128xf32, #tpu.memory_space<vmem>>, %arg6: memref<128x128xf32, #tpu.memory_space<vmem>>) attributes {dimension_semantics = [#tpu.dimension_semantics<parallel>, #tpu.dimension_semantics<parallel>, #tpu.dimension_semantics<arbitrary>], iteration_bounds = array<i64: 1, 1, 1>, scalar_prefetch = 0 : i64, scratch_operands = 1 : i64, tpu.core_type = #tpu.core_type<tc>, window_params = [{transform_indices = @transform_0, window_bounds = array<i64: 128, 128>}, {transform_indices = @transform_1, window_bounds = array<i64: 128, 128>}, {transform_indices = @transform_2, window_bounds = array<i64: 128, 128>}]} {
    %c0_i32 = arith.constant 0 : i32
    %0 = arith.cmpi eq, %arg2, %c0_i32 : i32
    %1 = arith.extui %0 : i1 to i32
    %c0_i32_0 = arith.constant 0 : i32
    %2 = arith.cmpi ne, %1, %c0_i32_0 : i32
    scf.if %2 {
      %cst_10 = arith.constant 0.000000e+00 : f32
      %12 = vector.broadcast %cst_10 : f32 to vector<128x128xf32>
      %c0_11 = arith.constant 0 : index
      %c0_12 = arith.constant 0 : index
      %13 = vector.load %arg6[%c0_11, %c0_12] : memref<128x128xf32, #tpu.memory_space<vmem>>, vector<128x128xf32>
      tpu.vector_store %arg6[%c0_11, %c0_12], %12 {strides = array<i32>} : memref<128x128xf32, #tpu.memory_space<vmem>>, vector<128x128xf32>,
    } else {
    }
    %c0 = arith.constant 0 : index
    %c0_1 = arith.constant 0 : index
    %3 = vector.load %arg6[%c0, %c0_1] : memref<128x128xf32, #tpu.memory_space<vmem>>, vector<128x128xf32>
    %c0_2 = arith.constant 0 : index
    %c0_3 = arith.constant 0 : index
    %4 = vector.load %arg3[%c0_2, %c0_3] : memref<128x128xbf16, #tpu.memory_space<vmem>>, vector<128x128xbf16>
    %c0_4 = arith.constant 0 : index
    %c0_5 = arith.constant 0 : index
    %5 = vector.load %arg4[%c0_4, %c0_5] : memref<128x128xbf16, #tpu.memory_space<vmem>>, vector<128x128xbf16>
    %cst = arith.constant dense<0.000000e+00> : vector<128x128xf32>
    %6 = tpu.matmul %4, %5, %cst {dimension_numbers = #tpu.dot_dimension_numbers<[1], [0], [0], [1], [0, 0, 1, 1], [], []>} : vector<128x128xbf16>, vector<128x128xbf16>, vector<128x128xf32> -> vector<128x128xf32>
    %7 = arith.addf %3, %6 : vector<128x128xf32>
    %c0_6 = arith.constant 0 : index
    %c0_7 = arith.constant 0 : index
    %8 = vector.load %arg6[%c0_6, %c0_7] : memref<128x128xf32, #tpu.memory_space<vmem>>, vector<128x128xf32>
    tpu.vector_store %arg6[%c0_6, %c0_7], %7 {strides = array<i32>} : memref<128x128xf32, #tpu.memory_space<vmem>>, vector<128x128xf32>,
    %c0_i32_8 = arith.constant 0 : i32
    %9 = arith.cmpi eq, %arg2, %c0_i32_8 : i32
    %10 = arith.extui %9 : i1 to i32
    %c0_i32_9 = arith.constant 0 : i32
    %11 = arith.cmpi ne, %10, %c0_i32_9 : i32
    scf.if %11 {
      %c0_10 = arith.constant 0 : index
      %c0_11 = arith.constant 0 : index
      %12 = vector.load %arg6[%c0_10, %c0_11] : memref<128x128xf32, #tpu.memory_space<vmem>>, vector<128x128xf32>
      %cst_12 = arith.constant 2.000000e-01 : f32
      %13 = vector.broadcast %cst_12 : f32 to vector<128x128xf32>
      %14 = arith.mulf %13, %12 : vector<128x128xf32>
      %15 = arith.maximumf %12, %14 : vector<128x128xf32>
      %c0_13 = arith.constant 0 : index
      %c0_14 = arith.constant 0 : index
      %16 = vector.load %arg5[%c0_13, %c0_14] : memref<128x128xf32, #tpu.memory_space<vmem>>, vector<128x128xf32>
      tpu.vector_store %arg5[%c0_13, %c0_14], %15 {strides = array<i32>} : memref<128x128xf32, #tpu.memory_space<vmem>>, vector<128x128xf32>,
    } else {
    }
    return
  }
  func.func @transform_0(%arg0: i32, %arg1: i32, %arg2: i32) -> (i32, i32) {
    %c0_i32 = arith.constant 0 : i32
    return %arg0, %arg2 : i32, i32
  }
  func.func @transform_1(%arg0: i32, %arg1: i32, %arg2: i32) -> (i32, i32) {
    %c0_i32 = arith.constant 0 : i32
    return %arg2, %arg1 : i32, i32
  }
  func.func @transform_2(%arg0: i32, %arg1: i32, %arg2: i32) -> (i32, i32) {
    %c0_i32 = arith.constant 0 : i32
    return %arg0, %arg1 : i32, i32
  }
}

module attributes {stable_mosaic.version = 11 : i64} {
  func.func @kernel(%arg0: i32, %arg1: i32, %arg2: i32, %arg3: memref<32x128xbf16, #tpu.memory_space<vmem>>, %arg4: memref<128x128xbf16, #tpu.memory_space<vmem>>, %arg5: memref<32x128xf32, #tpu.memory_space<vmem>>, %arg6: memref<32x128xf32, #tpu.memory_space<vmem>>) attributes {dimension_semantics = [#tpu.dimension_semantics<parallel>, #tpu.dimension_semantics<parallel>, #tpu.dimension_semantics<arbitrary>], iteration_bounds = array<i64: 1, 1, 1>, scalar_prefetch = 0 : i64, scratch_operands = 1 : i64, tpu.core_type = #tpu.core_type<tc>, window_params = [{transform_indices = @transform_0, window_bounds = array<i64: 32, 128>}, {transform_indices = @transform_1, window_bounds = array<i64: 128, 128>}, {transform_indices = @transform_2, window_bounds = array<i64: 32, 128>}]} {
    %c0_i32 = arith.constant 0 : i32
    %0 = arith.cmpi eq, %arg2, %c0_i32 : i32
    %1 = arith.extui %0 : i1 to i32
    %c0_i32_0 = arith.constant 0 : i32
    %2 = arith.cmpi ne, %1, %c0_i32_0 : i32
    scf.if %2 {
      %cst_10 = arith.constant 0.000000e+00 : f32
      %12 = vector.broadcast %cst_10 : f32 to vector<32x128xf32>
      %c0_11 = arith.constant 0 : index
      %c0_12 = arith.constant 0 : index
      %13 = vector.load %arg6[%c0_11, %c0_12] : memref<32x128xf32, #tpu.memory_space<vmem>>, vector<32x128xf32>
      tpu.vector_store %arg6[%c0_11, %c0_12], %12 {strides = array<i32>} : memref<32x128xf32, #tpu.memory_space<vmem>>, vector<32x128xf32>,
    } else {
    }
    %c0 = arith.constant 0 : index
    %c0_1 = arith.constant 0 : index
    %3 = vector.load %arg6[%c0, %c0_1] : memref<32x128xf32, #tpu.memory_space<vmem>>, vector<32x128xf32>
    %c0_2 = arith.constant 0 : index
    %c0_3 = arith.constant 0 : index
    %4 = vector.load %arg3[%c0_2, %c0_3] : memref<32x128xbf16, #tpu.memory_space<vmem>>, vector<32x128xbf16>
    %c0_4 = arith.constant 0 : index
    %c0_5 = arith.constant 0 : index
    %5 = vector.load %arg4[%c0_4, %c0_5] : memref<128x128xbf16, #tpu.memory_space<vmem>>, vector<128x128xbf16>
    %cst = arith.constant dense<0.000000e+00> : vector<32x128xf32>
    %6 = tpu.matmul %4, %5, %cst {dimension_numbers = #tpu.dot_dimension_numbers<[1], [0], [0], [1], [0, 0, 1, 1], [], []>} : vector<32x128xbf16>, vector<128x128xbf16>, vector<32x128xf32> -> vector<32x128xf32>
    %7 = arith.addf %3, %6 : vector<32x128xf32>
    %c0_6 = arith.constant 0 : index
    %c0_7 = arith.constant 0 : index
    %8 = vector.load %arg6[%c0_6, %c0_7] : memref<32x128xf32, #tpu.memory_space<vmem>>, vector<32x128xf32>
    tpu.vector_store %arg6[%c0_6, %c0_7], %7 {strides = array<i32>} : memref<32x128xf32, #tpu.memory_space<vmem>>, vector<32x128xf32>,
    %c0_i32_8 = arith.constant 0 : i32
    %9 = arith.cmpi eq, %arg2, %c0_i32_8 : i32
    %10 = arith.extui %9 : i1 to i32
    %c0_i32_9 = arith.constant 0 : i32
    %11 = arith.cmpi ne, %10, %c0_i32_9 : i32
    scf.if %11 {
      %c0_10 = arith.constant 0 : index
      %c0_11 = arith.constant 0 : index
      %12 = vector.load %arg6[%c0_10, %c0_11] : memref<32x128xf32, #tpu.memory_space<vmem>>, vector<32x128xf32>
      %c0_12 = arith.constant 0 : index
      %c0_13 = arith.constant 0 : index
      %13 = vector.load %arg5[%c0_12, %c0_13] : memref<32x128xf32, #tpu.memory_space<vmem>>, vector<32x128xf32>
      tpu.vector_store %arg5[%c0_12, %c0_13], %12 {strides = array<i32>} : memref<32x128xf32, #tpu.memory_space<vmem>>, vector<32x128xf32>,
    } else {
    }
    return
  }
  func.func @transform_0(%arg0: i32, %arg1: i32, %arg2: i32) -> (i32, i32) {
    %c0_i32 = arith.constant 0 : i32
    return %arg0, %arg2 : i32, i32
  }
  func.func @transform_1(%arg0: i32, %arg1: i32, %arg2: i32) -> (i32, i32) {
    %c0_i32 = arith.constant 0 : i32
    return %arg2, %arg1 : i32, i32
  }
  func.func @transform_2(%arg0: i32, %arg1: i32, %arg2: i32) -> (i32, i32) {
    %c0_i32 = arith.constant 0 : i32
    return %arg0, %arg1 : i32, i32
  }
}

module attributes {stable_mosaic.version = 11 : i64} {
  func.func @_bn_leaky_kernel(%arg0: i32, %arg1: i32, %arg2: memref<32x128xf32, #tpu.memory_space<vmem>>, %arg3: memref<1x128xf32, #tpu.memory_space<vmem>>, %arg4: memref<1x128xf32, #tpu.memory_space<vmem>>, %arg5: memref<32x128xf32, #tpu.memory_space<vmem>>) attributes {dimension_semantics = [#tpu.dimension_semantics<parallel>, #tpu.dimension_semantics<parallel>], iteration_bounds = array<i64: 1, 1>, scalar_prefetch = 0 : i64, scratch_operands = 0 : i64, tpu.core_type = #tpu.core_type<tc>, window_params = [{transform_indices = @transform_0, window_bounds = array<i64: 32, 128>}, {transform_indices = @transform_1, window_bounds = array<i64: 1, 128>}, {transform_indices = @transform_2, window_bounds = array<i64: 1, 128>}, {transform_indices = @transform_3, window_bounds = array<i64: 32, 128>}]} {
    %c0 = arith.constant 0 : index
    %c0_0 = arith.constant 0 : index
    %0 = vector.load %arg2[%c0, %c0_0] : memref<32x128xf32, #tpu.memory_space<vmem>>, vector<32x128xf32>
    %c0_1 = arith.constant 0 : index
    %c0_2 = arith.constant 0 : index
    %1 = vector.load %arg3[%c0_1, %c0_2] : memref<1x128xf32, #tpu.memory_space<vmem>>, vector<1x128xf32>
    %2 = vector.broadcast %1 : vector<1x128xf32> to vector<32x128xf32>
    %3 = arith.mulf %0, %2 : vector<32x128xf32>
    %c0_3 = arith.constant 0 : index
    %c0_4 = arith.constant 0 : index
    %4 = vector.load %arg4[%c0_3, %c0_4] : memref<1x128xf32, #tpu.memory_space<vmem>>, vector<1x128xf32>
    %5 = vector.broadcast %4 : vector<1x128xf32> to vector<32x128xf32>
    %6 = arith.addf %3, %5 : vector<32x128xf32>
    %cst = arith.constant 2.000000e-01 : f32
    %7 = vector.broadcast %cst : f32 to vector<32x128xf32>
    %8 = arith.mulf %7, %6 : vector<32x128xf32>
    %9 = arith.maximumf %6, %8 : vector<32x128xf32>
    %c0_5 = arith.constant 0 : index
    %c0_6 = arith.constant 0 : index
    %10 = vector.load %arg5[%c0_5, %c0_6] : memref<32x128xf32, #tpu.memory_space<vmem>>, vector<32x128xf32>
    tpu.vector_store %arg5[%c0_5, %c0_6], %9 {strides = array<i32>} : memref<32x128xf32, #tpu.memory_space<vmem>>, vector<32x128xf32>,
    return
  }
  func.func @transform_0(%arg0: i32, %arg1: i32) -> (i32, i32) {
    %c0_i32 = arith.constant 0 : i32
    return %arg0, %arg1 : i32, i32
  }
  func.func @transform_1(%arg0: i32, %arg1: i32) -> (i32, i32) {
    %c0_i32 = arith.constant 0 : i32
    %c0_i32_0 = arith.constant 0 : i32
    return %c0_i32, %arg1 : i32, i32
  }
  func.func @transform_2(%arg0: i32, %arg1: i32) -> (i32, i32) {
    %c0_i32 = arith.constant 0 : i32
    %c0_i32_0 = arith.constant 0 : i32
    return %c0_i32, %arg1 : i32, i32
  }
  func.func @transform_3(%arg0: i32, %arg1: i32) -> (i32, i32) {
    %c0_i32 = arith.constant 0 : i32
    return %arg0, %arg1 : i32, i32
  }
}

module attributes {stable_mosaic.version = 11 : i64} {
  func.func @kernel(%arg0: i32, %arg1: i32, %arg2: i32, %arg3: memref<16x256xbf16, #tpu.memory_space<vmem>>, %arg4: memref<256x128xbf16, #tpu.memory_space<vmem>>, %arg5: memref<16x128xf32, #tpu.memory_space<vmem>>, %arg6: memref<16x128xf32, #tpu.memory_space<vmem>>) attributes {dimension_semantics = [#tpu.dimension_semantics<parallel>, #tpu.dimension_semantics<parallel>, #tpu.dimension_semantics<arbitrary>], iteration_bounds = array<i64: 1, 1, 1>, scalar_prefetch = 0 : i64, scratch_operands = 1 : i64, tpu.core_type = #tpu.core_type<tc>, window_params = [{transform_indices = @transform_0, window_bounds = array<i64: 16, 256>}, {transform_indices = @transform_1, window_bounds = array<i64: 256, 128>}, {transform_indices = @transform_2, window_bounds = array<i64: 16, 128>}]} {
    %c0_i32 = arith.constant 0 : i32
    %0 = arith.cmpi eq, %arg2, %c0_i32 : i32
    %1 = arith.extui %0 : i1 to i32
    %c0_i32_0 = arith.constant 0 : i32
    %2 = arith.cmpi ne, %1, %c0_i32_0 : i32
    scf.if %2 {
      %cst_10 = arith.constant 0.000000e+00 : f32
      %12 = vector.broadcast %cst_10 : f32 to vector<16x128xf32>
      %c0_11 = arith.constant 0 : index
      %c0_12 = arith.constant 0 : index
      %13 = vector.load %arg6[%c0_11, %c0_12] : memref<16x128xf32, #tpu.memory_space<vmem>>, vector<16x128xf32>
      tpu.vector_store %arg6[%c0_11, %c0_12], %12 {strides = array<i32>} : memref<16x128xf32, #tpu.memory_space<vmem>>, vector<16x128xf32>,
    } else {
    }
    %c0 = arith.constant 0 : index
    %c0_1 = arith.constant 0 : index
    %3 = vector.load %arg6[%c0, %c0_1] : memref<16x128xf32, #tpu.memory_space<vmem>>, vector<16x128xf32>
    %c0_2 = arith.constant 0 : index
    %c0_3 = arith.constant 0 : index
    %4 = vector.load %arg3[%c0_2, %c0_3] : memref<16x256xbf16, #tpu.memory_space<vmem>>, vector<16x256xbf16>
    %c0_4 = arith.constant 0 : index
    %c0_5 = arith.constant 0 : index
    %5 = vector.load %arg4[%c0_4, %c0_5] : memref<256x128xbf16, #tpu.memory_space<vmem>>, vector<256x128xbf16>
    %cst = arith.constant dense<0.000000e+00> : vector<16x128xf32>
    %6 = tpu.matmul %4, %5, %cst {dimension_numbers = #tpu.dot_dimension_numbers<[1], [0], [0], [1], [0, 0, 1, 1], [], []>} : vector<16x256xbf16>, vector<256x128xbf16>, vector<16x128xf32> -> vector<16x128xf32>
    %7 = arith.addf %3, %6 : vector<16x128xf32>
    %c0_6 = arith.constant 0 : index
    %c0_7 = arith.constant 0 : index
    %8 = vector.load %arg6[%c0_6, %c0_7] : memref<16x128xf32, #tpu.memory_space<vmem>>, vector<16x128xf32>
    tpu.vector_store %arg6[%c0_6, %c0_7], %7 {strides = array<i32>} : memref<16x128xf32, #tpu.memory_space<vmem>>, vector<16x128xf32>,
    %c0_i32_8 = arith.constant 0 : i32
    %9 = arith.cmpi eq, %arg2, %c0_i32_8 : i32
    %10 = arith.extui %9 : i1 to i32
    %c0_i32_9 = arith.constant 0 : i32
    %11 = arith.cmpi ne, %10, %c0_i32_9 : i32
    scf.if %11 {
      %c0_10 = arith.constant 0 : index
      %c0_11 = arith.constant 0 : index
      %12 = vector.load %arg6[%c0_10, %c0_11] : memref<16x128xf32, #tpu.memory_space<vmem>>, vector<16x128xf32>
      %c0_12 = arith.constant 0 : index
      %c0_13 = arith.constant 0 : index
      %13 = vector.load %arg5[%c0_12, %c0_13] : memref<16x128xf32, #tpu.memory_space<vmem>>, vector<16x128xf32>
      tpu.vector_store %arg5[%c0_12, %c0_13], %12 {strides = array<i32>} : memref<16x128xf32, #tpu.memory_space<vmem>>, vector<16x128xf32>,
    } else {
    }
    return
  }
  func.func @transform_0(%arg0: i32, %arg1: i32, %arg2: i32) -> (i32, i32) {
    %c0_i32 = arith.constant 0 : i32
    return %arg0, %arg2 : i32, i32
  }
  func.func @transform_1(%arg0: i32, %arg1: i32, %arg2: i32) -> (i32, i32) {
    %c0_i32 = arith.constant 0 : i32
    return %arg2, %arg1 : i32, i32
  }
  func.func @transform_2(%arg0: i32, %arg1: i32, %arg2: i32) -> (i32, i32) {
    %c0_i32 = arith.constant 0 : i32
    return %arg0, %arg1 : i32, i32
  }
}

module attributes {stable_mosaic.version = 11 : i64} {
  func.func @_bn_leaky_kernel(%arg0: i32, %arg1: i32, %arg2: memref<8x128xf32, #tpu.memory_space<vmem>>, %arg3: memref<1x128xf32, #tpu.memory_space<vmem>>, %arg4: memref<1x128xf32, #tpu.memory_space<vmem>>, %arg5: memref<8x128xf32, #tpu.memory_space<vmem>>) attributes {dimension_semantics = [#tpu.dimension_semantics<parallel>, #tpu.dimension_semantics<parallel>], iteration_bounds = array<i64: 1, 1>, scalar_prefetch = 0 : i64, scratch_operands = 0 : i64, tpu.core_type = #tpu.core_type<tc>, window_params = [{transform_indices = @transform_0, window_bounds = array<i64: 8, 128>}, {transform_indices = @transform_1, window_bounds = array<i64: 1, 128>}, {transform_indices = @transform_2, window_bounds = array<i64: 1, 128>}, {transform_indices = @transform_3, window_bounds = array<i64: 8, 128>}]} {
    %c0 = arith.constant 0 : index
    %c0_0 = arith.constant 0 : index
    %0 = vector.load %arg2[%c0, %c0_0] : memref<8x128xf32, #tpu.memory_space<vmem>>, vector<8x128xf32>
    %c0_1 = arith.constant 0 : index
    %c0_2 = arith.constant 0 : index
    %1 = vector.load %arg3[%c0_1, %c0_2] : memref<1x128xf32, #tpu.memory_space<vmem>>, vector<1x128xf32>
    %2 = vector.broadcast %1 : vector<1x128xf32> to vector<8x128xf32>
    %3 = arith.mulf %0, %2 : vector<8x128xf32>
    %c0_3 = arith.constant 0 : index
    %c0_4 = arith.constant 0 : index
    %4 = vector.load %arg4[%c0_3, %c0_4] : memref<1x128xf32, #tpu.memory_space<vmem>>, vector<1x128xf32>
    %5 = vector.broadcast %4 : vector<1x128xf32> to vector<8x128xf32>
    %6 = arith.addf %3, %5 : vector<8x128xf32>
    %cst = arith.constant 2.000000e-01 : f32
    %7 = vector.broadcast %cst : f32 to vector<8x128xf32>
    %8 = arith.mulf %7, %6 : vector<8x128xf32>
    %9 = arith.maximumf %6, %8 : vector<8x128xf32>
    %c0_5 = arith.constant 0 : index
    %c0_6 = arith.constant 0 : index
    %10 = vector.load %arg5[%c0_5, %c0_6] : memref<8x128xf32, #tpu.memory_space<vmem>>, vector<8x128xf32>
    tpu.vector_store %arg5[%c0_5, %c0_6], %9 {strides = array<i32>} : memref<8x128xf32, #tpu.memory_space<vmem>>, vector<8x128xf32>,
    return
  }
  func.func @transform_0(%arg0: i32, %arg1: i32) -> (i32, i32) {
    %c0_i32 = arith.constant 0 : i32
    return %arg0, %arg1 : i32, i32
  }
  func.func @transform_1(%arg0: i32, %arg1: i32) -> (i32, i32) {
    %c0_i32 = arith.constant 0 : i32
    %c0_i32_0 = arith.constant 0 : i32
    return %c0_i32, %arg1 : i32, i32
  }
  func.func @transform_2(%arg0: i32, %arg1: i32) -> (i32, i32) {
    %c0_i32 = arith.constant 0 : i32
    %c0_i32_0 = arith.constant 0 : i32
    return %c0_i32, %arg1 : i32, i32
  }
  func.func @transform_3(%arg0: i32, %arg1: i32) -> (i32, i32) {
    %c0_i32 = arith.constant 0 : i32
    return %arg0, %arg1 : i32, i32
  }
}

module attributes {stable_mosaic.version = 11 : i64} {
  func.func @kernel(%arg0: i32, %arg1: i32, %arg2: i32, %arg3: memref<16x384xbf16, #tpu.memory_space<vmem>>, %arg4: memref<384x128xbf16, #tpu.memory_space<vmem>>, %arg5: memref<1x128xf32, #tpu.memory_space<vmem>>, %arg6: memref<16x128xf32, #tpu.memory_space<vmem>>, %arg7: memref<16x128xf32, #tpu.memory_space<vmem>>) attributes {dimension_semantics = [#tpu.dimension_semantics<parallel>, #tpu.dimension_semantics<parallel>, #tpu.dimension_semantics<arbitrary>], iteration_bounds = array<i64: 1, 1, 1>, scalar_prefetch = 0 : i64, scratch_operands = 1 : i64, tpu.core_type = #tpu.core_type<tc>, window_params = [{transform_indices = @transform_0, window_bounds = array<i64: 16, 384>}, {transform_indices = @transform_1, window_bounds = array<i64: 384, 128>}, {transform_indices = @transform_2, window_bounds = array<i64: 1, 128>}, {transform_indices = @transform_3, window_bounds = array<i64: 16, 128>}]} {
    %c0_i32 = arith.constant 0 : i32
    %0 = arith.cmpi eq, %arg2, %c0_i32 : i32
    %1 = arith.extui %0 : i1 to i32
    %c0_i32_0 = arith.constant 0 : i32
    %2 = arith.cmpi ne, %1, %c0_i32_0 : i32
    scf.if %2 {
      %cst_10 = arith.constant 0.000000e+00 : f32
      %12 = vector.broadcast %cst_10 : f32 to vector<16x128xf32>
      %c0_11 = arith.constant 0 : index
      %c0_12 = arith.constant 0 : index
      %13 = vector.load %arg7[%c0_11, %c0_12] : memref<16x128xf32, #tpu.memory_space<vmem>>, vector<16x128xf32>
      tpu.vector_store %arg7[%c0_11, %c0_12], %12 {strides = array<i32>} : memref<16x128xf32, #tpu.memory_space<vmem>>, vector<16x128xf32>,
    } else {
    }
    %c0 = arith.constant 0 : index
    %c0_1 = arith.constant 0 : index
    %3 = vector.load %arg7[%c0, %c0_1] : memref<16x128xf32, #tpu.memory_space<vmem>>, vector<16x128xf32>
    %c0_2 = arith.constant 0 : index
    %c0_3 = arith.constant 0 : index
    %4 = vector.load %arg3[%c0_2, %c0_3] : memref<16x384xbf16, #tpu.memory_space<vmem>>, vector<16x384xbf16>
    %c0_4 = arith.constant 0 : index
    %c0_5 = arith.constant 0 : index
    %5 = vector.load %arg4[%c0_4, %c0_5] : memref<384x128xbf16, #tpu.memory_space<vmem>>, vector<384x128xbf16>
    %cst = arith.constant dense<0.000000e+00> : vector<16x128xf32>
    %6 = tpu.matmul %4, %5, %cst {dimension_numbers = #tpu.dot_dimension_numbers<[1], [0], [0], [1], [0, 0, 1, 1], [], []>} : vector<16x384xbf16>, vector<384x128xbf16>, vector<16x128xf32> -> vector<16x128xf32>
    %7 = arith.addf %3, %6 : vector<16x128xf32>
    %c0_6 = arith.constant 0 : index
    %c0_7 = arith.constant 0 : index
    %8 = vector.load %arg7[%c0_6, %c0_7] : memref<16x128xf32, #tpu.memory_space<vmem>>, vector<16x128xf32>
    tpu.vector_store %arg7[%c0_6, %c0_7], %7 {strides = array<i32>} : memref<16x128xf32, #tpu.memory_space<vmem>>, vector<16x128xf32>,
    %c0_i32_8 = arith.constant 0 : i32
    %9 = arith.cmpi eq, %arg2, %c0_i32_8 : i32
    %10 = arith.extui %9 : i1 to i32
    %c0_i32_9 = arith.constant 0 : i32
    %11 = arith.cmpi ne, %10, %c0_i32_9 : i32
    scf.if %11 {
      %c0_10 = arith.constant 0 : index
      %c0_11 = arith.constant 0 : index
      %12 = vector.load %arg7[%c0_10, %c0_11] : memref<16x128xf32, #tpu.memory_space<vmem>>, vector<16x128xf32>
      %c0_12 = arith.constant 0 : index
      %c0_13 = arith.constant 0 : index
      %13 = vector.load %arg5[%c0_12, %c0_13] : memref<1x128xf32, #tpu.memory_space<vmem>>, vector<1x128xf32>
      %14 = vector.broadcast %13 : vector<1x128xf32> to vector<16x128xf32>
      %15 = arith.addf %12, %14 : vector<16x128xf32>
      %c0_14 = arith.constant 0 : index
      %c0_15 = arith.constant 0 : index
      %16 = vector.load %arg6[%c0_14, %c0_15] : memref<16x128xf32, #tpu.memory_space<vmem>>, vector<16x128xf32>
      tpu.vector_store %arg6[%c0_14, %c0_15], %15 {strides = array<i32>} : memref<16x128xf32, #tpu.memory_space<vmem>>, vector<16x128xf32>,
    } else {
    }
    return
  }
  func.func @transform_0(%arg0: i32, %arg1: i32, %arg2: i32) -> (i32, i32) {
    %c0_i32 = arith.constant 0 : i32
    return %arg0, %arg2 : i32, i32
  }
  func.func @transform_1(%arg0: i32, %arg1: i32, %arg2: i32) -> (i32, i32) {
    %c0_i32 = arith.constant 0 : i32
    return %arg2, %arg1 : i32, i32
  }
  func.func @transform_2(%arg0: i32, %arg1: i32, %arg2: i32) -> (i32, i32) {
    %c0_i32 = arith.constant 0 : i32
    %c0_i32_0 = arith.constant 0 : i32
    return %c0_i32, %arg1 : i32, i32
  }
  func.func @transform_3(%arg0: i32, %arg1: i32, %arg2: i32) -> (i32, i32) {
    %c0_i32 = arith.constant 0 : i32
    return %arg0, %arg1 : i32, i32
  }
}

module attributes {stable_mosaic.version = 11 : i64} {
  func.func @kernel(%arg0: i32, %arg1: i32, %arg2: i32, %arg3: memref<16x128xbf16, #tpu.memory_space<vmem>>, %arg4: memref<128x128xbf16, #tpu.memory_space<vmem>>, %arg5: memref<16x128xf32, #tpu.memory_space<vmem>>, %arg6: memref<16x128xf32, #tpu.memory_space<vmem>>) attributes {dimension_semantics = [#tpu.dimension_semantics<parallel>, #tpu.dimension_semantics<parallel>, #tpu.dimension_semantics<arbitrary>], iteration_bounds = array<i64: 1, 1, 1>, scalar_prefetch = 0 : i64, scratch_operands = 1 : i64, tpu.core_type = #tpu.core_type<tc>, window_params = [{transform_indices = @transform_0, window_bounds = array<i64: 16, 128>}, {transform_indices = @transform_1, window_bounds = array<i64: 128, 128>}, {transform_indices = @transform_2, window_bounds = array<i64: 16, 128>}]} {
    %c0_i32 = arith.constant 0 : i32
    %0 = arith.cmpi eq, %arg2, %c0_i32 : i32
    %1 = arith.extui %0 : i1 to i32
    %c0_i32_0 = arith.constant 0 : i32
    %2 = arith.cmpi ne, %1, %c0_i32_0 : i32
    scf.if %2 {
      %cst_10 = arith.constant 0.000000e+00 : f32
      %12 = vector.broadcast %cst_10 : f32 to vector<16x128xf32>
      %c0_11 = arith.constant 0 : index
      %c0_12 = arith.constant 0 : index
      %13 = vector.load %arg6[%c0_11, %c0_12] : memref<16x128xf32, #tpu.memory_space<vmem>>, vector<16x128xf32>
      tpu.vector_store %arg6[%c0_11, %c0_12], %12 {strides = array<i32>} : memref<16x128xf32, #tpu.memory_space<vmem>>, vector<16x128xf32>,
    } else {
    }
    %c0 = arith.constant 0 : index
    %c0_1 = arith.constant 0 : index
    %3 = vector.load %arg6[%c0, %c0_1] : memref<16x128xf32, #tpu.memory_space<vmem>>, vector<16x128xf32>
    %c0_2 = arith.constant 0 : index
    %c0_3 = arith.constant 0 : index
    %4 = vector.load %arg3[%c0_2, %c0_3] : memref<16x128xbf16, #tpu.memory_space<vmem>>, vector<16x128xbf16>
    %c0_4 = arith.constant 0 : index
    %c0_5 = arith.constant 0 : index
    %5 = vector.load %arg4[%c0_4, %c0_5] : memref<128x128xbf16, #tpu.memory_space<vmem>>, vector<128x128xbf16>
    %cst = arith.constant dense<0.000000e+00> : vector<16x128xf32>
    %6 = tpu.matmul %4, %5, %cst {dimension_numbers = #tpu.dot_dimension_numbers<[1], [0], [0], [1], [0, 0, 1, 1], [], []>} : vector<16x128xbf16>, vector<128x128xbf16>, vector<16x128xf32> -> vector<16x128xf32>
    %7 = arith.addf %3, %6 : vector<16x128xf32>
    %c0_6 = arith.constant 0 : index
    %c0_7 = arith.constant 0 : index
    %8 = vector.load %arg6[%c0_6, %c0_7] : memref<16x128xf32, #tpu.memory_space<vmem>>, vector<16x128xf32>
    tpu.vector_store %arg6[%c0_6, %c0_7], %7 {strides = array<i32>} : memref<16x128xf32, #tpu.memory_space<vmem>>, vector<16x128xf32>,
    %c0_i32_8 = arith.constant 0 : i32
    %9 = arith.cmpi eq, %arg2, %c0_i32_8 : i32
    %10 = arith.extui %9 : i1 to i32
    %c0_i32_9 = arith.constant 0 : i32
    %11 = arith.cmpi ne, %10, %c0_i32_9 : i32
    scf.if %11 {
      %c0_10 = arith.constant 0 : index
      %c0_11 = arith.constant 0 : index
      %12 = vector.load %arg6[%c0_10, %c0_11] : memref<16x128xf32, #tpu.memory_space<vmem>>, vector<16x128xf32>
      %cst_12 = arith.constant 2.000000e-01 : f32
      %13 = vector.broadcast %cst_12 : f32 to vector<16x128xf32>
      %14 = arith.mulf %13, %12 : vector<16x128xf32>
      %15 = arith.maximumf %12, %14 : vector<16x128xf32>
      %c0_13 = arith.constant 0 : index
      %c0_14 = arith.constant 0 : index
      %16 = vector.load %arg5[%c0_13, %c0_14] : memref<16x128xf32, #tpu.memory_space<vmem>>, vector<16x128xf32>
      tpu.vector_store %arg5[%c0_13, %c0_14], %15 {strides = array<i32>} : memref<16x128xf32, #tpu.memory_space<vmem>>, vector<16x128xf32>,
    } else {
    }
    return
  }
  func.func @transform_0(%arg0: i32, %arg1: i32, %arg2: i32) -> (i32, i32) {
    %c0_i32 = arith.constant 0 : i32
    return %arg0, %arg2 : i32, i32
  }
  func.func @transform_1(%arg0: i32, %arg1: i32, %arg2: i32) -> (i32, i32) {
    %c0_i32 = arith.constant 0 : i32
    return %arg2, %arg1 : i32, i32
  }
  func.func @transform_2(%arg0: i32, %arg1: i32, %arg2: i32) -> (i32, i32) {
    %c0_i32 = arith.constant 0 : i32
    return %arg0, %arg1 : i32, i32
  }
}

module attributes {stable_mosaic.version = 11 : i64} {
  func.func @kernel(%arg0: i32, %arg1: i32, %arg2: i32, %arg3: memref<16x128xbf16, #tpu.memory_space<vmem>>, %arg4: memref<128x128xbf16, #tpu.memory_space<vmem>>, %arg5: memref<16x128xf32, #tpu.memory_space<vmem>>, %arg6: memref<16x128xf32, #tpu.memory_space<vmem>>) attributes {dimension_semantics = [#tpu.dimension_semantics<parallel>, #tpu.dimension_semantics<parallel>, #tpu.dimension_semantics<arbitrary>], iteration_bounds = array<i64: 1, 1, 1>, scalar_prefetch = 0 : i64, scratch_operands = 1 : i64, tpu.core_type = #tpu.core_type<tc>, window_params = [{transform_indices = @transform_0, window_bounds = array<i64: 16, 128>}, {transform_indices = @transform_1, window_bounds = array<i64: 128, 128>}, {transform_indices = @transform_2, window_bounds = array<i64: 16, 128>}]} {
    %c0_i32 = arith.constant 0 : i32
    %0 = arith.cmpi eq, %arg2, %c0_i32 : i32
    %1 = arith.extui %0 : i1 to i32
    %c0_i32_0 = arith.constant 0 : i32
    %2 = arith.cmpi ne, %1, %c0_i32_0 : i32
    scf.if %2 {
      %cst_10 = arith.constant 0.000000e+00 : f32
      %12 = vector.broadcast %cst_10 : f32 to vector<16x128xf32>
      %c0_11 = arith.constant 0 : index
      %c0_12 = arith.constant 0 : index
      %13 = vector.load %arg6[%c0_11, %c0_12] : memref<16x128xf32, #tpu.memory_space<vmem>>, vector<16x128xf32>
      tpu.vector_store %arg6[%c0_11, %c0_12], %12 {strides = array<i32>} : memref<16x128xf32, #tpu.memory_space<vmem>>, vector<16x128xf32>,
    } else {
    }
    %c0 = arith.constant 0 : index
    %c0_1 = arith.constant 0 : index
    %3 = vector.load %arg6[%c0, %c0_1] : memref<16x128xf32, #tpu.memory_space<vmem>>, vector<16x128xf32>
    %c0_2 = arith.constant 0 : index
    %c0_3 = arith.constant 0 : index
    %4 = vector.load %arg3[%c0_2, %c0_3] : memref<16x128xbf16, #tpu.memory_space<vmem>>, vector<16x128xbf16>
    %c0_4 = arith.constant 0 : index
    %c0_5 = arith.constant 0 : index
    %5 = vector.load %arg4[%c0_4, %c0_5] : memref<128x128xbf16, #tpu.memory_space<vmem>>, vector<128x128xbf16>
    %cst = arith.constant dense<0.000000e+00> : vector<16x128xf32>
    %6 = tpu.matmul %4, %5, %cst {dimension_numbers = #tpu.dot_dimension_numbers<[1], [0], [0], [1], [0, 0, 1, 1], [], []>} : vector<16x128xbf16>, vector<128x128xbf16>, vector<16x128xf32> -> vector<16x128xf32>
    %7 = arith.addf %3, %6 : vector<16x128xf32>
    %c0_6 = arith.constant 0 : index
    %c0_7 = arith.constant 0 : index
    %8 = vector.load %arg6[%c0_6, %c0_7] : memref<16x128xf32, #tpu.memory_space<vmem>>, vector<16x128xf32>
    tpu.vector_store %arg6[%c0_6, %c0_7], %7 {strides = array<i32>} : memref<16x128xf32, #tpu.memory_space<vmem>>, vector<16x128xf32>,
    %c0_i32_8 = arith.constant 0 : i32
    %9 = arith.cmpi eq, %arg2, %c0_i32_8 : i32
    %10 = arith.extui %9 : i1 to i32
    %c0_i32_9 = arith.constant 0 : i32
    %11 = arith.cmpi ne, %10, %c0_i32_9 : i32
    scf.if %11 {
      %c0_10 = arith.constant 0 : index
      %c0_11 = arith.constant 0 : index
      %12 = vector.load %arg6[%c0_10, %c0_11] : memref<16x128xf32, #tpu.memory_space<vmem>>, vector<16x128xf32>
      %c0_12 = arith.constant 0 : index
      %c0_13 = arith.constant 0 : index
      %13 = vector.load %arg5[%c0_12, %c0_13] : memref<16x128xf32, #tpu.memory_space<vmem>>, vector<16x128xf32>
      tpu.vector_store %arg5[%c0_12, %c0_13], %12 {strides = array<i32>} : memref<16x128xf32, #tpu.memory_space<vmem>>, vector<16x128xf32>,
    } else {
    }
    return
  }
  func.func @transform_0(%arg0: i32, %arg1: i32, %arg2: i32) -> (i32, i32) {
    %c0_i32 = arith.constant 0 : i32
    return %arg0, %arg2 : i32, i32
  }
  func.func @transform_1(%arg0: i32, %arg1: i32, %arg2: i32) -> (i32, i32) {
    %c0_i32 = arith.constant 0 : i32
    return %arg2, %arg1 : i32, i32
  }
  func.func @transform_2(%arg0: i32, %arg1: i32, %arg2: i32) -> (i32, i32) {
    %c0_i32 = arith.constant 0 : i32
    return %arg0, %arg1 : i32, i32
  }
}

module attributes {stable_mosaic.version = 11 : i64} {
  func.func @kernel(%arg0: i32, %arg1: i32, %arg2: i32, %arg3: memref<16x128xbf16, #tpu.memory_space<vmem>>, %arg4: memref<128x128xbf16, #tpu.memory_space<vmem>>, %arg5: memref<1x128xf32, #tpu.memory_space<vmem>>, %arg6: memref<16x128xf32, #tpu.memory_space<vmem>>, %arg7: memref<16x128xf32, #tpu.memory_space<vmem>>) attributes {dimension_semantics = [#tpu.dimension_semantics<parallel>, #tpu.dimension_semantics<parallel>, #tpu.dimension_semantics<arbitrary>], iteration_bounds = array<i64: 1, 1, 1>, scalar_prefetch = 0 : i64, scratch_operands = 1 : i64, tpu.core_type = #tpu.core_type<tc>, window_params = [{transform_indices = @transform_0, window_bounds = array<i64: 16, 128>}, {transform_indices = @transform_1, window_bounds = array<i64: 128, 128>}, {transform_indices = @transform_2, window_bounds = array<i64: 1, 128>}, {transform_indices = @transform_3, window_bounds = array<i64: 16, 128>}]} {
    %c0_i32 = arith.constant 0 : i32
    %0 = arith.cmpi eq, %arg2, %c0_i32 : i32
    %1 = arith.extui %0 : i1 to i32
    %c0_i32_0 = arith.constant 0 : i32
    %2 = arith.cmpi ne, %1, %c0_i32_0 : i32
    scf.if %2 {
      %cst_10 = arith.constant 0.000000e+00 : f32
      %12 = vector.broadcast %cst_10 : f32 to vector<16x128xf32>
      %c0_11 = arith.constant 0 : index
      %c0_12 = arith.constant 0 : index
      %13 = vector.load %arg7[%c0_11, %c0_12] : memref<16x128xf32, #tpu.memory_space<vmem>>, vector<16x128xf32>
      tpu.vector_store %arg7[%c0_11, %c0_12], %12 {strides = array<i32>} : memref<16x128xf32, #tpu.memory_space<vmem>>, vector<16x128xf32>,
    } else {
    }
    %c0 = arith.constant 0 : index
    %c0_1 = arith.constant 0 : index
    %3 = vector.load %arg7[%c0, %c0_1] : memref<16x128xf32, #tpu.memory_space<vmem>>, vector<16x128xf32>
    %c0_2 = arith.constant 0 : index
    %c0_3 = arith.constant 0 : index
    %4 = vector.load %arg3[%c0_2, %c0_3] : memref<16x128xbf16, #tpu.memory_space<vmem>>, vector<16x128xbf16>
    %c0_4 = arith.constant 0 : index
    %c0_5 = arith.constant 0 : index
    %5 = vector.load %arg4[%c0_4, %c0_5] : memref<128x128xbf16, #tpu.memory_space<vmem>>, vector<128x128xbf16>
    %cst = arith.constant dense<0.000000e+00> : vector<16x128xf32>
    %6 = tpu.matmul %4, %5, %cst {dimension_numbers = #tpu.dot_dimension_numbers<[1], [0], [0], [1], [0, 0, 1, 1], [], []>} : vector<16x128xbf16>, vector<128x128xbf16>, vector<16x128xf32> -> vector<16x128xf32>
    %7 = arith.addf %3, %6 : vector<16x128xf32>
    %c0_6 = arith.constant 0 : index
    %c0_7 = arith.constant 0 : index
    %8 = vector.load %arg7[%c0_6, %c0_7] : memref<16x128xf32, #tpu.memory_space<vmem>>, vector<16x128xf32>
    tpu.vector_store %arg7[%c0_6, %c0_7], %7 {strides = array<i32>} : memref<16x128xf32, #tpu.memory_space<vmem>>, vector<16x128xf32>,
    %c0_i32_8 = arith.constant 0 : i32
    %9 = arith.cmpi eq, %arg2, %c0_i32_8 : i32
    %10 = arith.extui %9 : i1 to i32
    %c0_i32_9 = arith.constant 0 : i32
    %11 = arith.cmpi ne, %10, %c0_i32_9 : i32
    scf.if %11 {
      %c0_10 = arith.constant 0 : index
      %c0_11 = arith.constant 0 : index
      %12 = vector.load %arg7[%c0_10, %c0_11] : memref<16x128xf32, #tpu.memory_space<vmem>>, vector<16x128xf32>
      %c0_12 = arith.constant 0 : index
      %c0_13 = arith.constant 0 : index
      %13 = vector.load %arg5[%c0_12, %c0_13] : memref<1x128xf32, #tpu.memory_space<vmem>>, vector<1x128xf32>
      %14 = vector.broadcast %13 : vector<1x128xf32> to vector<16x128xf32>
      %15 = arith.addf %12, %14 : vector<16x128xf32>
      %cst_14 = arith.constant 2.000000e-01 : f32
      %16 = vector.broadcast %cst_14 : f32 to vector<16x128xf32>
      %17 = arith.mulf %16, %15 : vector<16x128xf32>
      %18 = arith.maximumf %15, %17 : vector<16x128xf32>
      %c0_15 = arith.constant 0 : index
      %c0_16 = arith.constant 0 : index
      %19 = vector.load %arg6[%c0_15, %c0_16] : memref<16x128xf32, #tpu.memory_space<vmem>>, vector<16x128xf32>
      tpu.vector_store %arg6[%c0_15, %c0_16], %18 {strides = array<i32>} : memref<16x128xf32, #tpu.memory_space<vmem>>, vector<16x128xf32>,
    } else {
    }
    return
  }
  func.func @transform_0(%arg0: i32, %arg1: i32, %arg2: i32) -> (i32, i32) {
    %c0_i32 = arith.constant 0 : i32
    return %arg0, %arg2 : i32, i32
  }
  func.func @transform_1(%arg0: i32, %arg1: i32, %arg2: i32) -> (i32, i32) {
    %c0_i32 = arith.constant 0 : i32
    return %arg2, %arg1 : i32, i32
  }
  func.func @transform_2(%arg0: i32, %arg1: i32, %arg2: i32) -> (i32, i32) {
    %c0_i32 = arith.constant 0 : i32
    %c0_i32_0 = arith.constant 0 : i32
    return %c0_i32, %arg1 : i32, i32
  }
  func.func @transform_3(%arg0: i32, %arg1: i32, %arg2: i32) -> (i32, i32) {
    %c0_i32 = arith.constant 0 : i32
    return %arg0, %arg1 : i32, i32
  }
}

module attributes {stable_mosaic.version = 11 : i64} {
  func.func @_gemm_zadd_kernel(%arg0: i32, %arg1: i32, %arg2: i32, %arg3: i32, %arg4: memref<1x16x128xbf16, #tpu.memory_space<vmem>>, %arg5: memref<128x128xbf16, #tpu.memory_space<vmem>>, %arg6: memref<1x1x128xf32, #tpu.memory_space<vmem>>, %arg7: memref<1x16x128xf32, #tpu.memory_space<vmem>>, %arg8: memref<16x128xf32, #tpu.memory_space<vmem>>) attributes {dimension_semantics = [#tpu.dimension_semantics<parallel>, #tpu.dimension_semantics<parallel>, #tpu.dimension_semantics<parallel>, #tpu.dimension_semantics<arbitrary>], iteration_bounds = array<i64: 2, 1, 1, 1>, scalar_prefetch = 0 : i64, scratch_operands = 1 : i64, tpu.core_type = #tpu.core_type<tc>, window_params = [{transform_indices = @transform_0, window_bounds = array<i64: 1, 16, 128>}, {transform_indices = @transform_1, window_bounds = array<i64: 128, 128>}, {transform_indices = @transform_2, window_bounds = array<i64: 1, 1, 128>}, {transform_indices = @transform_3, window_bounds = array<i64: 1, 16, 128>}]} {
    %c0_i32 = arith.constant 0 : i32
    %0 = arith.cmpi eq, %arg3, %c0_i32 : i32
    %1 = arith.extui %0 : i1 to i32
    %c0_i32_0 = arith.constant 0 : i32
    %2 = arith.cmpi ne, %1, %c0_i32_0 : i32
    scf.if %2 {
      %cst_11 = arith.constant 0.000000e+00 : f32
      %13 = vector.broadcast %cst_11 : f32 to vector<16x128xf32>
      %c0_12 = arith.constant 0 : index
      %c0_13 = arith.constant 0 : index
      %14 = vector.load %arg8[%c0_12, %c0_13] : memref<16x128xf32, #tpu.memory_space<vmem>>, vector<16x128xf32>
      tpu.vector_store %arg8[%c0_12, %c0_13], %13 {strides = array<i32>} : memref<16x128xf32, #tpu.memory_space<vmem>>, vector<16x128xf32>,
    } else {
    }
    %c0 = arith.constant 0 : index
    %c0_1 = arith.constant 0 : index
    %3 = vector.load %arg8[%c0, %c0_1] : memref<16x128xf32, #tpu.memory_space<vmem>>, vector<16x128xf32>
    %c0_2 = arith.constant 0 : index
    %c0_3 = arith.constant 0 : index
    %c0_4 = arith.constant 0 : index
    %4 = vector.load %arg4[%c0_2, %c0_3, %c0_4] : memref<1x16x128xbf16, #tpu.memory_space<vmem>>, vector<1x16x128xbf16>
    %5 = vector.shape_cast %4 : vector<1x16x128xbf16> to vector<16x128xbf16>
    %c0_5 = arith.constant 0 : index
    %c0_6 = arith.constant 0 : index
    %6 = vector.load %arg5[%c0_5, %c0_6] : memref<128x128xbf16, #tpu.memory_space<vmem>>, vector<128x128xbf16>
    %cst = arith.constant dense<0.000000e+00> : vector<16x128xf32>
    %7 = tpu.matmul %5, %6, %cst {dimension_numbers = #tpu.dot_dimension_numbers<[1], [0], [0], [1], [0, 0, 1, 1], [], []>} : vector<16x128xbf16>, vector<128x128xbf16>, vector<16x128xf32> -> vector<16x128xf32>
    %8 = arith.addf %3, %7 : vector<16x128xf32>
    %c0_7 = arith.constant 0 : index
    %c0_8 = arith.constant 0 : index
    %9 = vector.load %arg8[%c0_7, %c0_8] : memref<16x128xf32, #tpu.memory_space<vmem>>, vector<16x128xf32>
    tpu.vector_store %arg8[%c0_7, %c0_8], %8 {strides = array<i32>} : memref<16x128xf32, #tpu.memory_space<vmem>>, vector<16x128xf32>,
    %c0_i32_9 = arith.constant 0 : i32
    %10 = arith.cmpi eq, %arg3, %c0_i32_9 : i32
    %11 = arith.extui %10 : i1 to i32
    %c0_i32_10 = arith.constant 0 : i32
    %12 = arith.cmpi ne, %11, %c0_i32_10 : i32
    scf.if %12 {
      %c0_11 = arith.constant 0 : index
      %c0_12 = arith.constant 0 : index
      %13 = vector.load %arg8[%c0_11, %c0_12] : memref<16x128xf32, #tpu.memory_space<vmem>>, vector<16x128xf32>
      %c0_13 = arith.constant 0 : index
      %c0_14 = arith.constant 0 : index
      %c0_15 = arith.constant 0 : index
      %14 = vector.load %arg6[%c0_13, %c0_14, %c0_15] : memref<1x1x128xf32, #tpu.memory_space<vmem>>, vector<1x1x128xf32>
      %15 = vector.shape_cast %14 : vector<1x1x128xf32> to vector<1x128xf32>
      %16 = vector.broadcast %15 : vector<1x128xf32> to vector<16x128xf32>
      %17 = arith.addf %13, %16 : vector<16x128xf32>
      %cst_16 = arith.constant 2.000000e-01 : f32
      %18 = vector.broadcast %cst_16 : f32 to vector<16x128xf32>
      %19 = arith.mulf %18, %17 : vector<16x128xf32>
      %20 = arith.maximumf %17, %19 : vector<16x128xf32>
      %c0_17 = arith.constant 0 : index
      %c0_18 = arith.constant 0 : index
      %c0_19 = arith.constant 0 : index
      %21 = vector.load %arg7[%c0_17, %c0_18, %c0_19] : memref<1x16x128xf32, #tpu.memory_space<vmem>>, vector<1x16x128xf32>
      %22 = vector.shape_cast %21 : vector<1x16x128xf32> to vector<16x128xf32>
      %23 = vector.shape_cast %20 : vector<16x128xf32> to vector<1x16x128xf32>
      tpu.vector_store %arg7[%c0_17, %c0_18, %c0_19], %23 {strides = array<i32>} : memref<1x16x128xf32, #tpu.memory_space<vmem>>, vector<1x16x128xf32>,
    } else {
    }
    return
  }
  func.func @transform_0(%arg0: i32, %arg1: i32, %arg2: i32, %arg3: i32) -> (i32, i32, i32) {
    %c0_i32 = arith.constant 0 : i32
    return %arg0, %arg1, %arg3 : i32, i32, i32
  }
  func.func @transform_1(%arg0: i32, %arg1: i32, %arg2: i32, %arg3: i32) -> (i32, i32) {
    %c0_i32 = arith.constant 0 : i32
    return %arg3, %arg2 : i32, i32
  }
  func.func @transform_2(%arg0: i32, %arg1: i32, %arg2: i32, %arg3: i32) -> (i32, i32, i32) {
    %c0_i32 = arith.constant 0 : i32
    %c0_i32_0 = arith.constant 0 : i32
    return %arg0, %c0_i32, %arg2 : i32, i32, i32
  }
  func.func @transform_3(%arg0: i32, %arg1: i32, %arg2: i32, %arg3: i32) -> (i32, i32, i32) {
    %c0_i32 = arith.constant 0 : i32
    return %arg0, %arg1, %arg2 : i32, i32, i32
  }
}

module attributes {stable_mosaic.version = 11 : i64} {
  func.func @kernel(%arg0: i32, %arg1: i32, %arg2: i32, %arg3: memref<16x128xbf16, #tpu.memory_space<vmem>>, %arg4: memref<128x128xbf16, #tpu.memory_space<vmem>>, %arg5: memref<1x128xf32, #tpu.memory_space<vmem>>, %arg6: memref<16x128xf32, #tpu.memory_space<vmem>>, %arg7: memref<16x128xf32, #tpu.memory_space<vmem>>) attributes {dimension_semantics = [#tpu.dimension_semantics<parallel>, #tpu.dimension_semantics<parallel>, #tpu.dimension_semantics<arbitrary>], iteration_bounds = array<i64: 1, 1, 1>, scalar_prefetch = 0 : i64, scratch_operands = 1 : i64, tpu.core_type = #tpu.core_type<tc>, window_params = [{transform_indices = @transform_0, window_bounds = array<i64: 16, 128>}, {transform_indices = @transform_1, window_bounds = array<i64: 128, 128>}, {transform_indices = @transform_2, window_bounds = array<i64: 1, 128>}, {transform_indices = @transform_3, window_bounds = array<i64: 16, 128>}]} {
    %c0_i32 = arith.constant 0 : i32
    %0 = arith.cmpi eq, %arg2, %c0_i32 : i32
    %1 = arith.extui %0 : i1 to i32
    %c0_i32_0 = arith.constant 0 : i32
    %2 = arith.cmpi ne, %1, %c0_i32_0 : i32
    scf.if %2 {
      %cst_10 = arith.constant 0.000000e+00 : f32
      %12 = vector.broadcast %cst_10 : f32 to vector<16x128xf32>
      %c0_11 = arith.constant 0 : index
      %c0_12 = arith.constant 0 : index
      %13 = vector.load %arg7[%c0_11, %c0_12] : memref<16x128xf32, #tpu.memory_space<vmem>>, vector<16x128xf32>
      tpu.vector_store %arg7[%c0_11, %c0_12], %12 {strides = array<i32>} : memref<16x128xf32, #tpu.memory_space<vmem>>, vector<16x128xf32>,
    } else {
    }
    %c0 = arith.constant 0 : index
    %c0_1 = arith.constant 0 : index
    %3 = vector.load %arg7[%c0, %c0_1] : memref<16x128xf32, #tpu.memory_space<vmem>>, vector<16x128xf32>
    %c0_2 = arith.constant 0 : index
    %c0_3 = arith.constant 0 : index
    %4 = vector.load %arg3[%c0_2, %c0_3] : memref<16x128xbf16, #tpu.memory_space<vmem>>, vector<16x128xbf16>
    %c0_4 = arith.constant 0 : index
    %c0_5 = arith.constant 0 : index
    %5 = vector.load %arg4[%c0_4, %c0_5] : memref<128x128xbf16, #tpu.memory_space<vmem>>, vector<128x128xbf16>
    %cst = arith.constant dense<0.000000e+00> : vector<16x128xf32>
    %6 = tpu.matmul %4, %5, %cst {dimension_numbers = #tpu.dot_dimension_numbers<[1], [0], [0], [1], [0, 0, 1, 1], [], []>} : vector<16x128xbf16>, vector<128x128xbf16>, vector<16x128xf32> -> vector<16x128xf32>
    %7 = arith.addf %3, %6 : vector<16x128xf32>
    %c0_6 = arith.constant 0 : index
    %c0_7 = arith.constant 0 : index
    %8 = vector.load %arg7[%c0_6, %c0_7] : memref<16x128xf32, #tpu.memory_space<vmem>>, vector<16x128xf32>
    tpu.vector_store %arg7[%c0_6, %c0_7], %7 {strides = array<i32>} : memref<16x128xf32, #tpu.memory_space<vmem>>, vector<16x128xf32>,
    %c0_i32_8 = arith.constant 0 : i32
    %9 = arith.cmpi eq, %arg2, %c0_i32_8 : i32
    %10 = arith.extui %9 : i1 to i32
    %c0_i32_9 = arith.constant 0 : i32
    %11 = arith.cmpi ne, %10, %c0_i32_9 : i32
    scf.if %11 {
      %c0_10 = arith.constant 0 : index
      %c0_11 = arith.constant 0 : index
      %12 = vector.load %arg7[%c0_10, %c0_11] : memref<16x128xf32, #tpu.memory_space<vmem>>, vector<16x128xf32>
      %c0_12 = arith.constant 0 : index
      %c0_13 = arith.constant 0 : index
      %13 = vector.load %arg5[%c0_12, %c0_13] : memref<1x128xf32, #tpu.memory_space<vmem>>, vector<1x128xf32>
      %14 = vector.broadcast %13 : vector<1x128xf32> to vector<16x128xf32>
      %15 = arith.addf %12, %14 : vector<16x128xf32>
      %16 = arith.negf %15 : vector<16x128xf32>
      %17 = math.exp %16 : vector<16x128xf32>
      %cst_14 = arith.constant 1.000000e+00 : f32
      %18 = vector.broadcast %cst_14 : f32 to vector<16x128xf32>
      %19 = arith.addf %18, %17 : vector<16x128xf32>
      %20 = arith.divf %18, %19 : vector<16x128xf32>
      %c0_15 = arith.constant 0 : index
      %c0_16 = arith.constant 0 : index
      %21 = vector.load %arg6[%c0_15, %c0_16] : memref<16x128xf32, #tpu.memory_space<vmem>>, vector<16x128xf32>
      tpu.vector_store %arg6[%c0_15, %c0_16], %20 {strides = array<i32>} : memref<16x128xf32, #tpu.memory_space<vmem>>, vector<16x128xf32>,
    } else {
    }
    return
  }
  func.func @transform_0(%arg0: i32, %arg1: i32, %arg2: i32) -> (i32, i32) {
    %c0_i32 = arith.constant 0 : i32
    return %arg0, %arg2 : i32, i32
  }
  func.func @transform_1(%arg0: i32, %arg1: i32, %arg2: i32) -> (i32, i32) {
    %c0_i32 = arith.constant 0 : i32
    return %arg2, %arg1 : i32, i32
  }
  func.func @transform_2(%arg0: i32, %arg1: i32, %arg2: i32) -> (i32, i32) {
    %c0_i32 = arith.constant 0 : i32
    %c0_i32_0 = arith.constant 0 : i32
    return %c0_i32, %arg1 : i32, i32
  }
  func.func @transform_3(%arg0: i32, %arg1: i32, %arg2: i32) -> (i32, i32) {
    %c0_i32 = arith.constant 0 : i32
    return %arg0, %arg1 : i32, i32
  }
}

</mosaic_0001>

<bundles_post_ra>
// kernel: _lambda_.14
= control target key start
LH: loop header
LB: loop body
LE: loop exit
PB: predicated region body
PF: predicated region fallthrough
CT: control target
= control target key end

     0   :  { %s583_s1 = inlined_call_operand.vmem [shape: bf16[128,128], index: 1, kind: input, shape index: {}]   ;;  %s584_s0 = inlined_call_operand.vmem [shape: bf16[128,128], index: 0, kind: input, shape index: {}]   ;;  %s585_s2 = inlined_call_operand.vmem [shape: f32[128,128], index: 2, kind: output, shape index: {}]  }
   0x1   :  { %v456_v0 = vld [vmem:[%s583_s1] sm:$0xff]   ;;  %v457_v1 = vld [vmem:[%s583_s1 + $0x8] sm:$0xff]   ;;  %v458_v2 = vld [vmem:[%s583_s1 + $0x10] sm:$0xff]  }
   0x2   :  { %408 = vmatprep.subr.bf16.mxu0 %v456_v0  ;;  %440 = vmatprep.subr.bf16.mxu1 %v456_v0  ;;  %v459_v3 = vld [vmem:[%s583_s1 + $0x18] sm:$0xff]   ;;  %v464_v4 = vld [vmem:[%s584_s0] sm:$0xff]   ;;  %v461_v7 = vld [vmem:[%s583_s1 + $0x28] sm:$0xff]  }
   0x3   :  { %409 = vmatpush3.bf16.msra.mxu0 %v456_v0  ;;  %448 = vmatpush3.bf16.msra.mxu1 %v456_v0  ;;  %v465_v5 = vld [vmem:[%s584_s0 + $0x20] sm:$0xff]   ;;  %v462_v8 = vld [vmem:[%s583_s1 + $0x30] sm:$0xff]   ;;  %v463_v9 = vld [vmem:[%s583_s1 + $0x38] sm:$0xff]  }
   0x4   :  { %410 = vmatprep.subr.bf16.mxu0 %v457_v1  ;;  %441 = vmatprep.subr.bf16.mxu1 %v457_v1  ;;  %v460_v6 = vld [vmem:[%s583_s1 + $0x20] sm:$0xff]   ;;  %v466_v10 = vld [vmem:[%s584_s0 + $0x8] sm:$0xff]   ;;  %v468_v12 = vld [vmem:[%s584_s0 + $0x10] sm:$0xff]  }
   0x5   :  { %424 = vmatprep.mubr.bf16.mxu0 %v464_v4  ;;  %432 = vmatprep.mubr.bf16.mxu1 %v465_v5  ;;  %v467_v11 = vld [vmem:[%s584_s0 + $0x28] sm:$0xff]   ;;  %v469_v13 = vld [vmem:[%s584_s0 + $0x30] sm:$0xff]   ;;  %v470_v14 = vld [vmem:[%s584_s0 + $0x18] sm:$0xff]  }
   0x6   :  { %v471_v15 = vld [vmem:[%s584_s0 + $0x38] sm:$0xff]  }
   0x7   :  { %411 = vmatpush3.bf16.msra.mxu0 %v457_v1  ;;  %449 = vmatpush3.bf16.msra.mxu1 %v457_v1 }
   0x8   :  { %412 = vmatprep.subr.bf16.mxu0 %v458_v2  ;;  %442 = vmatprep.subr.bf16.mxu1 %v458_v2 }
   0xb   :  { %413 = vmatpush3.bf16.msra.mxu0 %v458_v2  ;;  %450 = vmatpush3.bf16.msra.mxu1 %v458_v2 }
   0xc   :  { %414 = vmatprep.subr.bf16.mxu0 %v459_v3  ;;  %443 = vmatprep.subr.bf16.mxu1 %v459_v3 }
   0xf   :  { %415 = vmatpush3.bf16.msra.mxu0 %v459_v3  ;;  %451 = vmatpush3.bf16.msra.mxu1 %v459_v3 }
  0x10   :  { %416 = vmatprep.subr.bf16.mxu0 %v460_v6  ;;  %444 = vmatprep.subr.bf16.mxu1 %v460_v6 }
  0x13   :  { %417 = vmatpush3.bf16.msra.mxu0 %v460_v6  ;;  %452 = vmatpush3.bf16.msra.mxu1 %v460_v6 }
  0x14   :  { %418 = vmatprep.subr.bf16.mxu0 %v461_v7  ;;  %445 = vmatprep.subr.bf16.mxu1 %v461_v7 }
  0x17   :  { %419 = vmatpush3.bf16.msra.mxu0 %v461_v7  ;;  %453 = vmatpush3.bf16.msra.mxu1 %v461_v7 }
  0x18   :  { %420 = vmatprep.subr.bf16.mxu0 %v462_v8  ;;  %446 = vmatprep.subr.bf16.mxu1 %v462_v8 }
  0x1b   :  { %421 = vmatpush3.bf16.msra.mxu0 %v462_v8  ;;  %454 = vmatpush3.bf16.msra.mxu1 %v462_v8 }
  0x1c   :  { %422 = vmatprep.subr.bf16.mxu0 %v463_v9  ;;  %447 = vmatprep.subr.bf16.mxu1 %v463_v9 }
  0x1f   :  { %423 = vmatpush3.bf16.msra.mxu0 %v463_v9  ;;  %455 = vmatpush3.bf16.msra.mxu1 %v463_v9 }
  0x22   :  { %425 = vmatmul.mubr.bf16.vlgmr.msra.gmra.mrb[0].mxu0 %v466_v10  ;;  %433 = vmatmul.mubr.bf16.vlgmr.msra.gmra.mrb[0].mxu1 %v467_v11 }
  0x23   :  { %428 = vmatprep.mubr.bf16.mxu0 %v468_v12  ;;  %436 = vmatprep.mubr.bf16.mxu1 %v469_v13 }
  0x2a   :  { %429 = vmatmul.mubr.bf16.gmra.mrb[4].mxu0 %v470_v14  ;;  %437 = vmatmul.mubr.bf16.gmra.mrb[4].mxu1 %v471_v15 }
  0xf5   :  { %v426_v16 = vpop.f32.mrb[0].mxu0  ;;  %v434_v17 = vpop.f32.mrb[0].mxu1 }
  0xf6   :  { %v326_v18 = vmul.f32 0.2, %v426_v16  ;;  %v334_v19 = vmul.f32 0.2, %v434_v17  ;;  %v210_v20 = vpop.f32.mrb[1].mxu0  ;;  %v242_v21 = vpop.f32.mrb[1].mxu1 }
  0xf7   :  { %v324_v22 = vmul.f32 0.2, %v210_v20  ;;  %v332_v23 = vmul.f32 0.2, %v242_v21  ;;  %v427_v24 = vpop.f32.mrb[2].mxu0  ;;  %v435_v25 = vpop.f32.mrb[2].mxu1 }
  0xf8   :  { %v342_v26 = vmax.f32 %v426_v16, %v326_v18  ;;  %v350_v27 = vmax.f32 %v434_v17, %v334_v19  ;;  %v327_v28 = vmul.f32 0.2, %v427_v24  ;;  %v335_v29 = vmul.f32 0.2, %v435_v25  ;;  %v213_v30 = vpop.f32.mrb[3].mxu0  ;;  %v245_v31 = vpop.f32.mrb[3].mxu1 }
  0xf9   :  { %v340_v32 = vmax.f32 %v210_v20, %v324_v22  ;;  %v348_v33 = vmax.f32 %v242_v21, %v332_v23  ;;  %v325_v34 = vmul.f32 0.2, %v213_v30  ;;  %v333_v35 = vmul.f32 0.2, %v245_v31 }
  0xfa   :  { %358 = vst [vmem:[%s585_s2 + $0x10] sm:$0xff] %v342_v26  ;;  %366 = vst [vmem:[%s585_s2 + $0x50] sm:$0xff] %v350_v27  ;;  %v343_v36 = vmax.f32 %v427_v24, %v327_v28  ;;  %v351_v37 = vmax.f32 %v435_v25, %v335_v29 }
  0xfb   :  { %356 = vst [vmem:[%s585_s2] sm:$0xff] %v340_v32  ;;  %364 = vst [vmem:[%s585_s2 + $0x40] sm:$0xff] %v348_v33  ;;  %v341_v38 = vmax.f32 %v213_v30, %v325_v34  ;;  %v349_v39 = vmax.f32 %v245_v31, %v333_v35 }
  0xfc   :  { %359 = vst [vmem:[%s585_s2 + $0x18] sm:$0xff] %v343_v36  ;;  %367 = vst [vmem:[%s585_s2 + $0x58] sm:$0xff] %v351_v37 }
  0xfd   :  { %357 = vst [vmem:[%s585_s2 + $0x8] sm:$0xff] %v341_v38  ;;  %365 = vst [vmem:[%s585_s2 + $0x48] sm:$0xff] %v349_v39  ;;  %v430_v40 = vpop.f32.mrb[4].mxu0  ;;  %v438_v41 = vpop.f32.mrb[4].mxu1 }
  0xfe   :  { %v330_v42 = vmul.f32 0.2, %v430_v40  ;;  %v338_v43 = vmul.f32 0.2, %v438_v41  ;;  %v226_v44 = vpop.f32.mrb[5].mxu0  ;;  %v258_v45 = vpop.f32.mrb[5].mxu1 }
  0xff   :  { %v328_v46 = vmul.f32 0.2, %v226_v44  ;;  %v336_v47 = vmul.f32 0.2, %v258_v45  ;;  %v431_v48 = vpop.f32.mrb[6].mxu0  ;;  %v439_v49 = vpop.f32.mrb[6].mxu1 }
 0x100   :  { %v346_v50 = vmax.f32 %v430_v40, %v330_v42  ;;  %v354_v51 = vmax.f32 %v438_v41, %v338_v43  ;;  %v331_v52 = vmul.f32 0.2, %v431_v48  ;;  %v339_v53 = vmul.f32 0.2, %v439_v49  ;;  %v229_v54 = vpop.f32.mrb[7].mxu0  ;;  %v261_v55 = vpop.f32.mrb[7].mxu1 }
 0x101   :  { %v344_v56 = vmax.f32 %v226_v44, %v328_v46  ;;  %v352_v57 = vmax.f32 %v258_v45, %v336_v47  ;;  %v329_v58 = vmul.f32 0.2, %v229_v54  ;;  %v337_v59 = vmul.f32 0.2, %v261_v55 }
 0x102   :  { %362 = vst [vmem:[%s585_s2 + $0x30] sm:$0xff] %v346_v50  ;;  %370 = vst [vmem:[%s585_s2 + $0x70] sm:$0xff] %v354_v51  ;;  %v347_v60 = vmax.f32 %v431_v48, %v331_v52  ;;  %v355_v61 = vmax.f32 %v439_v49, %v339_v53 }
 0x103   :  { %360 = vst [vmem:[%s585_s2 + $0x20] sm:$0xff] %v344_v56  ;;  %368 = vst [vmem:[%s585_s2 + $0x60] sm:$0xff] %v352_v57  ;;  %v345_v62 = vmax.f32 %v229_v54, %v329_v58  ;;  %v353_v63 = vmax.f32 %v261_v55, %v337_v59 }
 0x104   :  { %363 = vst [vmem:[%s585_s2 + $0x38] sm:$0xff] %v347_v60  ;;  %371 = vst [vmem:[%s585_s2 + $0x78] sm:$0xff] %v355_v61 }
 0x105   :  { %361 = vst [vmem:[%s585_s2 + $0x28] sm:$0xff] %v345_v62  ;;  %369 = vst [vmem:[%s585_s2 + $0x68] sm:$0xff] %v353_v63 }

// kernel: _lambda_.15
= control target key start
LH: loop header
LB: loop body
LE: loop exit
PB: predicated region body
PF: predicated region fallthrough
CT: control target
= control target key end

     0   :  { %s283_s1 = inlined_call_operand.vmem [shape: bf16[128,128], index: 1, kind: input, shape index: {}]   ;;  %s284_s0 = inlined_call_operand.vmem [shape: bf16[32,128], index: 0, kind: input, shape index: {}]   ;;  %s285_s2 = inlined_call_operand.vmem [shape: f32[32,128], index: 2, kind: output, shape index: {}]  }
   0x1   :  { %v216_v0 = vld [vmem:[%s283_s1] sm:$0xff]   ;;  %v217_v1 = vld [vmem:[%s283_s1 + $0x8] sm:$0xff]   ;;  %v218_v2 = vld [vmem:[%s283_s1 + $0x10] sm:$0xff]  }
   0x2   :  { %196 = vmatprep.subr.bf16.mxu0 %v216_v0  ;;  %v219_v3 = vld [vmem:[%s283_s1 + $0x18] sm:$0xff]   ;;  %v224_v4 = vld [vmem:[%s284_s0] sm:$0xff]   ;;  %v221_v6 = vld [vmem:[%s283_s1 + $0x28] sm:$0xff]  }
   0x3   :  { %197 = vmatpush3.bf16.msra.mxu0 %v216_v0  ;;  %212 = vmatprep.mubr.bf16.mxu0 %v224_v4  ;;  %v220_v5 = vld [vmem:[%s283_s1 + $0x20] sm:$0xff]   ;;  %v222_v7 = vld [vmem:[%s283_s1 + $0x30] sm:$0xff]   ;;  %v223_v8 = vld [vmem:[%s283_s1 + $0x38] sm:$0xff]  }
   0x4   :  { %198 = vmatprep.subr.bf16.mxu0 %v217_v1  ;;  %v225_v9 = vld [vmem:[%s284_s0 + $0x8] sm:$0xff]  }
   0x7   :  { %199 = vmatpush3.bf16.msra.mxu0 %v217_v1 }
   0x8   :  { %200 = vmatprep.subr.bf16.mxu0 %v218_v2 }
   0xb   :  { %201 = vmatpush3.bf16.msra.mxu0 %v218_v2 }
   0xc   :  { %202 = vmatprep.subr.bf16.mxu0 %v219_v3 }
   0xf   :  { %203 = vmatpush3.bf16.msra.mxu0 %v219_v3 }
  0x10   :  { %204 = vmatprep.subr.bf16.mxu0 %v220_v5 }
  0x13   :  { %205 = vmatpush3.bf16.msra.mxu0 %v220_v5 }
  0x14   :  { %206 = vmatprep.subr.bf16.mxu0 %v221_v6 }
  0x17   :  { %207 = vmatpush3.bf16.msra.mxu0 %v221_v6 }
  0x18   :  { %208 = vmatprep.subr.bf16.mxu0 %v222_v7 }
  0x1b   :  { %209 = vmatpush3.bf16.msra.mxu0 %v222_v7 }
  0x1c   :  { %210 = vmatprep.subr.bf16.mxu0 %v223_v8 }
  0x1f   :  { %211 = vmatpush3.bf16.msra.mxu0 %v223_v8 }
  0x22   :  { %213 = vmatmul.mubr.bf16.vlgmr.msra.gmra.mrb[0].mxu0 %v225_v9 }
  0xf5   :  { %v214_v10 = vpop.f32.mrb[0].mxu0 }
  0xf6   :  { %170 = vst [vmem:[%s285_s2 + $0x10] sm:$0xff] %v214_v10  ;;  %v138_v11 = vpop.f32.mrb[1].mxu0 }
  0xf7   :  { %168 = vst [vmem:[%s285_s2] sm:$0xff] %v138_v11  ;;  %v215_v12 = vpop.f32.mrb[2].mxu0 }
  0xf8   :  { %171 = vst [vmem:[%s285_s2 + $0x18] sm:$0xff] %v215_v12  ;;  %v141_v13 = vpop.f32.mrb[3].mxu0 }
  0xf9   :  { %169 = vst [vmem:[%s285_s2 + $0x8] sm:$0xff] %v141_v13 }

// kernel: _lambda_.16
= control target key start
LH: loop header
LB: loop body
LE: loop exit
PB: predicated region body
PF: predicated region fallthrough
CT: control target
= control target key end

     0   :  { %s108_s0 = inlined_call_operand.vmem [shape: f32[32,128], index: 0, kind: input, shape index: {}]   ;;  %s109_s1 = inlined_call_operand.vmem [shape: f32[1,128], index: 1, kind: input, shape index: {}]   ;;  %s110_s2 = inlined_call_operand.vmem [shape: f32[1,128], index: 2, kind: input, shape index: {}]   ;;  %s111_s3 = inlined_call_operand.vmem [shape: f32[32,128], index: 3, kind: output, shape index: {}]  }
   0x1   :  { %v14_v0 = vld [vmem:[%s108_s0] sm:$0xff]  ;;  %v15_v4 = vld [vmem:[%s108_s0 + $0x8] sm:$0xff]  ;;  %v16_v5 = vld [vmem:[%s108_s0 + $0x10] sm:$0xff] }
   0x2   :  { %v56_v1 = vld [vmem:[%s109_s1] ss:$0 sm:$0xff]  ;;  %v17_v6 = vld [vmem:[%s108_s0 + $0x18] sm:$0xff] }
   0x3   :  { %v57_v2 = vld [vmem:[%s110_s2] ss:$0 sm:$0xff]  ;;  %v25_v3 = vmul.f32 %v56_v1, %v14_v0  ;;  %v26_v7 = vmul.f32 %v56_v1, %v15_v4  ;;  %v27_v8 = vmul.f32 %v56_v1, %v16_v5  ;;  %v28_v9 = vmul.f32 %v56_v1, %v17_v6 }
   0x5   :  { %v36_v10 = vadd.f32 %v57_v2, %v25_v3  ;;  %v37_v11 = vadd.f32 %v57_v2, %v26_v7  ;;  %v38_v12 = vadd.f32 %v57_v2, %v27_v8  ;;  %v39_v13 = vadd.f32 %v57_v2, %v28_v9 }
   0x7   :  { %v40_v14 = vmul.f32 0.2, %v36_v10  ;;  %v41_v15 = vmul.f32 0.2, %v37_v11  ;;  %v42_v16 = vmul.f32 0.2, %v38_v12 }
   0x8   :  { %v43_v17 = vmul.f32 0.2, %v39_v13 }
   0x9   :  { %v44_v18 = vmax.f32 %v36_v10, %v40_v14  ;;  %v45_v19 = vmax.f32 %v37_v11, %v41_v15  ;;  %v46_v20 = vmax.f32 %v38_v12, %v42_v16 }
   0xa   :  { %v47_v21 = vmax.f32 %v39_v13, %v43_v17 }
   0xb   :  { %48 = vst [vmem:[%s111_s3] sm:$0xff] %v44_v18  ;;  %49 = vst [vmem:[%s111_s3 + $0x8] sm:$0xff] %v45_v19 }
   0xc   :  { %50 = vst [vmem:[%s111_s3 + $0x10] sm:$0xff] %v46_v20  ;;  %51 = vst [vmem:[%s111_s3 + $0x18] sm:$0xff] %v47_v21 }

// kernel: _lambda_.17
= control target key start
LH: loop header
LB: loop body
LE: loop exit
PB: predicated region body
PF: predicated region fallthrough
CT: control target
= control target key end

     0   :  { %s350_s1 = inlined_call_operand.vmem [shape: bf16[256,128], index: 1, kind: input, shape index: {}]   ;;  %s351_s0 = inlined_call_operand.vmem [shape: bf16[16,256], index: 0, kind: input, shape index: {}]   ;;  %s352_s2 = inlined_call_operand.vmem [shape: f32[16,128], index: 2, kind: output, shape index: {}]  }
   0x1   :  { %v256_v0 = vld [vmem:[%s350_s1 + $0x40] sm:$0xff]   ;;  %v258_v2 = vld [vmem:[%s350_s1 + $0x48] sm:$0xff]   ;;  %v260_v4 = vld [vmem:[%s350_s1 + $0x50] sm:$0xff]  }
   0x2   :  { %v257_v1 = vld [vmem:[%s350_s1] sm:$0xff]   ;;  %234 = vmatprep.subr.bf16.mxu0 %v256_v0  ;;  %v259_v3 = vld [vmem:[%s350_s1 + $0x8] sm:$0xff]   ;;  %v261_v5 = vld [vmem:[%s350_s1 + $0x10] sm:$0xff]  }
   0x3   :  { %235 = vmatpush3.bf16.msra.mxu0 %v257_v1  ;;  %v262_v6 = vld [vmem:[%s350_s1 + $0x58] sm:$0xff]   ;;  %v264_v8 = vld [vmem:[%s350_s1 + $0x60] sm:$0xff]   ;;  %v266_v10 = vld [vmem:[%s350_s1 + $0x68] sm:$0xff]  }
   0x4   :  { %236 = vmatprep.subr.bf16.mxu0 %v258_v2  ;;  %v263_v7 = vld [vmem:[%s350_s1 + $0x18] sm:$0xff]   ;;  %v265_v9 = vld [vmem:[%s350_s1 + $0x20] sm:$0xff]   ;;  %v267_v12 = vld [vmem:[%s350_s1 + $0x28] sm:$0xff]  }
   0x5   :  { %v274_v11 = vld [vmem:[%s351_s0 + $0x4] ss:$8 sps:$4 sm:$0xff]   ;;  %v268_v13 = vld [vmem:[%s350_s1 + $0x70] sm:$0xff]   ;;  %v270_v15 = vld [vmem:[%s350_s1 + $0x78] sm:$0xff]  }
   0x6   :  { %192 = vmatprep.mubr.bf16.mxu0 %v274_v11  ;;  %v269_v14 = vld [vmem:[%s350_s1 + $0x30] sm:$0xff]   ;;  %v271_v16 = vld [vmem:[%s350_s1 + $0x38] sm:$0xff]   ;;  %v272_v17 = vld [vmem:[%s351_s0] ss:$8 sps:$4 sm:$0xff]  }
   0x7   :  { %237 = vmatpush3.bf16.msra.mxu0 %v259_v3 }
   0x8   :  { %238 = vmatprep.subr.bf16.mxu0 %v260_v4 }
   0xb   :  { %239 = vmatpush3.bf16.msra.mxu0 %v261_v5 }
   0xc   :  { %240 = vmatprep.subr.bf16.mxu0 %v262_v6 }
   0xf   :  { %241 = vmatpush3.bf16.msra.mxu0 %v263_v7 }
  0x10   :  { %242 = vmatprep.subr.bf16.mxu0 %v264_v8 }
  0x13   :  { %243 = vmatpush3.bf16.msra.mxu0 %v265_v9 }
  0x14   :  { %244 = vmatprep.subr.bf16.mxu0 %v266_v10 }
  0x17   :  { %245 = vmatpush3.bf16.msra.mxu0 %v267_v12 }
  0x18   :  { %246 = vmatprep.subr.bf16.mxu0 %v268_v13 }
  0x1b   :  { %247 = vmatpush3.bf16.msra.mxu0 %v269_v14 }
  0x1c   :  { %248 = vmatprep.subr.bf16.mxu0 %v270_v15 }
  0x1f   :  { %249 = vmatpush3.bf16.msra.mxu0 %v271_v16 }
  0x22   :  { %193 = vmatmul.mubr.bf16.vlgmr.msra.gmra.mrb[0].mxu0 %v272_v17 }
  0xf5   :  { %v250_v18 = vpop.f32.mrb[0].mxu0 }
  0xf6   :  { %v251_v19 = vpop.f32.mrb[1].mxu0 }
  0xf7   :  { %v252_v20 = vadd.f32 %v251_v19, %v250_v18  ;;  %v253_v21 = vpop.f32.mrb[2].mxu0 }
  0xf8   :  { %v254_v22 = vpop.f32.mrb[3].mxu0 }
  0xf9   :  { %210 = vst [vmem:[%s352_s2] sm:$0xff] %v252_v20  ;;  %v255_v23 = vadd.f32 %v254_v22, %v253_v21 }
  0xfb   :  { %211 = vst [vmem:[%s352_s2 + $0x8] sm:$0xff] %v255_v23 }

// kernel: _lambda_.18
= control target key start
LH: loop header
LB: loop body
LE: loop exit
PB: predicated region body
PF: predicated region fallthrough
CT: control target
= control target key end

     0   :  { %s72_s0 = inlined_call_operand.vmem [shape: f32[8,128], index: 0, kind: input, shape index: {}]   ;;  %s73_s1 = inlined_call_operand.vmem [shape: f32[1,128], index: 1, kind: input, shape index: {}]   ;;  %s74_s2 = inlined_call_operand.vmem [shape: f32[1,128], index: 2, kind: input, shape index: {}]   ;;  %s75_s3 = inlined_call_operand.vmem [shape: f32[8,128], index: 3, kind: output, shape index: {}]  }
   0x1   :  { %v14_v0 = vld [vmem:[%s72_s0] sm:$0xff] }
   0x2   :  { %v38_v1 = vld [vmem:[%s73_s1] ss:$0 sm:$0xff] }
   0x3   :  { %v39_v2 = vld [vmem:[%s74_s2] ss:$0 sm:$0xff]  ;;  %v22_v3 = vmul.f32 %v38_v1, %v14_v0 }
   0x5   :  { %v30_v4 = vadd.f32 %v39_v2, %v22_v3 }
   0x7   :  { %v31_v5 = vmul.f32 0.2, %v30_v4 }
   0x9   :  { %v32_v6 = vmax.f32 %v30_v4, %v31_v5 }
   0xb   :  { %33 = vst [vmem:[%s75_s3] sm:$0xff] %v32_v6 }

// kernel: _lambda_.21
= control target key start
LH: loop header
LB: loop body
LE: loop exit
PB: predicated region body
PF: predicated region fallthrough
CT: control target
= control target key end

     0   :  { %v201_v0 = vmov 0.0   ;;  %vm202_vm0 = vmmov 0   ;;  %s251_s1 = inlined_call_operand.vmem [shape: bf16[128,128], index: 1, kind: input, shape index: {}]   ;;  %s252_s0 = inlined_call_operand.vmem [shape: bf16[16,128], index: 0, kind: input, shape index: {}]   ;;  %s253_s2 = inlined_call_operand.vmem [shape: f32[16,128], index: 2, kind: output, shape index: {}]  }
   0x1   :  { %170 = vmatprep.subr.bf16.mxu0 %v201_v0  ;;  %v192_v1 = vld [vmem:[%s251_s1] sm:$0xff]   ;;  %186 = vmatprep.mubr.msk.bf16.mxu0 %vm202_vm0, %v201_v0  ;;  %v193_v2 = vld [vmem:[%s251_s1 + $0x8] sm:$0xff]   ;;  %v194_v3 = vld [vmem:[%s251_s1 + $0x10] sm:$0xff]  }
   0x2   :  { %171 = vmatpush3.bf16.msra.mxu0 %v192_v1  ;;  %v195_v4 = vld [vmem:[%s251_s1 + $0x18] sm:$0xff]   ;;  %v196_v5 = vld [vmem:[%s251_s1 + $0x20] sm:$0xff]   ;;  %v197_v6 = vld [vmem:[%s251_s1 + $0x28] sm:$0xff]  }
   0x3   :  { %172 = vmatprep.subr.bf16.mxu0 %v201_v0  ;;  %v198_v7 = vld [vmem:[%s251_s1 + $0x30] sm:$0xff]   ;;  %v199_v8 = vld [vmem:[%s251_s1 + $0x38] sm:$0xff]   ;;  %v200_v9 = vld [vmem:[%s252_s0] sm:$0xff]  }
   0x6   :  { %173 = vmatpush3.bf16.msra.mxu0 %v193_v2 }
   0x7   :  { %174 = vmatprep.subr.bf16.mxu0 %v201_v0 }
   0xa   :  { %175 = vmatpush3.bf16.msra.mxu0 %v194_v3 }
   0xb   :  { %176 = vmatprep.subr.bf16.mxu0 %v201_v0 }
   0xe   :  { %177 = vmatpush3.bf16.msra.mxu0 %v195_v4 }
   0xf   :  { %178 = vmatprep.subr.bf16.mxu0 %v201_v0 }
  0x12   :  { %179 = vmatpush3.bf16.msra.mxu0 %v196_v5 }
  0x13   :  { %180 = vmatprep.subr.bf16.mxu0 %v201_v0 }
  0x16   :  { %181 = vmatpush3.bf16.msra.mxu0 %v197_v6 }
  0x17   :  { %182 = vmatprep.subr.bf16.mxu0 %v201_v0 }
  0x1a   :  { %183 = vmatpush3.bf16.msra.mxu0 %v198_v7 }
  0x1b   :  { %184 = vmatprep.subr.bf16.mxu0 %v201_v0 }
  0x1e   :  { %185 = vmatpush3.bf16.msra.mxu0 %v199_v8 }
  0x21   :  { %187 = vmatmul.mubr.bf16.vlgmr.msra.gmra.mrb[0].mxu0 %v200_v9 }
  0xf4   :  { %v126_v10 = vpop.f32.mrb[0].mxu0 }
  0xf5   :  { %v142_v11 = vmul.f32 0.2, %v126_v10  ;;  %v188_v12 = vpop.f32.mrb[1].mxu0 }
  0xf6   :  { %v129_v13 = vpop.f32.mrb[2].mxu0 }
  0xf7   :  { %v144_v14 = vmax.f32 %v126_v10, %v142_v11  ;;  %v143_v15 = vmul.f32 0.2, %v129_v13  ;;  %v189_v16 = vpop.f32.mrb[3].mxu0 }
  0xf9   :  { %146 = vst [vmem:[%s253_s2] sm:$0xff] %v144_v14  ;;  %v145_v17 = vmax.f32 %v129_v13, %v143_v15 }
  0xfb   :  { %147 = vst [vmem:[%s253_s2 + $0x8] sm:$0xff] %v145_v17 }

// kernel: _lambda_.19
= control target key start
LH: loop header
LB: loop body
LE: loop exit
PB: predicated region body
PF: predicated region fallthrough
CT: control target
= control target key end

     0   :  { %v450_v1 = vmov 0.0   ;;  %vm451_vm0 = vmmov 0   ;;  %s562_s1 = inlined_call_operand.vmem [shape: bf16[384,128], index: 1, kind: input, shape index: {}]   ;;  %s563_s0 = inlined_call_operand.vmem [shape: bf16[16,384], index: 0, kind: input, shape index: {}]   ;;  %s564_s2 = inlined_call_operand.vmem [shape: f32[1,128], index: 2, kind: input, shape index: {}]   ;;  %s565_s3 = inlined_call_operand.vmem [shape: f32[16,128], index: 3, kind: output, shape index: {}]  }
   0x1   :  { %v422_v0 = vld [vmem:[%s562_s1 + $0x40] sm:$0xff]   ;;  %400 = vmatprep.subr.bf16.mxu1 %v450_v1  ;;  %416 = vmatprep.mubr.msk.bf16.mxu1 %vm451_vm0, %v450_v1  ;;  %v425_v4 = vld [vmem:[%s562_s1 + $0x48] sm:$0xff]   ;;  %v428_v7 = vld [vmem:[%s562_s1 + $0x50] sm:$0xff]  }
   0x2   :  { %v423_v2 = vld [vmem:[%s562_s1] sm:$0xff]   ;;  %369 = vmatprep.subr.bf16.mxu0 %v422_v0  ;;  %v426_v5 = vld [vmem:[%s562_s1 + $0x8] sm:$0xff]   ;;  %v429_v8 = vld [vmem:[%s562_s1 + $0x10] sm:$0xff]  }
   0x3   :  { %v424_v3 = vld [vmem:[%s562_s1 + $0x80] sm:$0xff]   ;;  %370 = vmatpush3.bf16.msra.mxu0 %v423_v2  ;;  %v427_v6 = vld [vmem:[%s562_s1 + $0x88] sm:$0xff]   ;;  %v430_v9 = vld [vmem:[%s562_s1 + $0x90] sm:$0xff]  }
   0x4   :  { %401 = vmatpush3.bf16.msra.mxu1 %v424_v3  ;;  %371 = vmatprep.subr.bf16.mxu0 %v425_v4  ;;  %v431_v10 = vld [vmem:[%s562_s1 + $0x58] sm:$0xff]   ;;  %v434_v13 = vld [vmem:[%s562_s1 + $0x60] sm:$0xff]   ;;  %v437_v16 = vld [vmem:[%s562_s1 + $0x68] sm:$0xff]  }
   0x5   :  { %402 = vmatprep.subr.bf16.mxu1 %v450_v1  ;;  %v432_v11 = vld [vmem:[%s562_s1 + $0x18] sm:$0xff]   ;;  %v435_v14 = vld [vmem:[%s562_s1 + $0x20] sm:$0xff]   ;;  %v438_v17 = vld [vmem:[%s562_s1 + $0x28] sm:$0xff]  }
   0x6   :  { %v433_v12 = vld [vmem:[%s562_s1 + $0x98] sm:$0xff]   ;;  %v436_v15 = vld [vmem:[%s562_s1 + $0xa0] sm:$0xff]   ;;  %v439_v18 = vld [vmem:[%s562_s1 + $0xa8] sm:$0xff]  }
   0x7   :  { %372 = vmatpush3.bf16.msra.mxu0 %v426_v5  ;;  %v440_v19 = vld [vmem:[%s562_s1 + $0x70] sm:$0xff]   ;;  %v443_v22 = vld [vmem:[%s562_s1 + $0x78] sm:$0xff]   ;;  %v446_v26 = vld [vmem:[%s563_s0] ss:$12 sps:$4 sm:$0xff]  }
   0x8   :  { %403 = vmatpush3.bf16.msra.mxu1 %v427_v6  ;;  %373 = vmatprep.subr.bf16.mxu0 %v428_v7  ;;  %v441_v20 = vld [vmem:[%s562_s1 + $0x30] sm:$0xff]   ;;  %v444_v24 = vld [vmem:[%s562_s1 + $0x38] sm:$0xff]   ;;  %v368_v34 = vld [vmem:[%s564_s2] ss:$0 sm:$0xff] }
   0x9   :  { %404 = vmatprep.subr.bf16.mxu1 %v450_v1  ;;  %v442_v21 = vld [vmem:[%s562_s1 + $0xb0] sm:$0xff]   ;;  %v445_v25 = vld [vmem:[%s562_s1 + $0xb8] sm:$0xff]  }
   0xa   :  { %v448_v23 = vld [vmem:[%s563_s0 + $0x4] ss:$12 sps:$4 sm:$0xff]   ;;  %v449_v27 = vld [vmem:[%s563_s0 + $0x8] ss:$12 sps:$4 sm:$0xff]  }
   0xb   :  { %374 = vmatpush3.bf16.msra.mxu0 %v429_v8  ;;  %267 = vmatprep.mubr.bf16.mxu0 %v448_v23 }
   0xc   :  { %405 = vmatpush3.bf16.msra.mxu1 %v430_v9  ;;  %375 = vmatprep.subr.bf16.mxu0 %v431_v10 }
   0xd   :  { %406 = vmatprep.subr.bf16.mxu1 %v450_v1 }
   0xf   :  { %376 = vmatpush3.bf16.msra.mxu0 %v432_v11 }
  0x10   :  { %407 = vmatpush3.bf16.msra.mxu1 %v433_v12  ;;  %377 = vmatprep.subr.bf16.mxu0 %v434_v13 }
  0x11   :  { %408 = vmatprep.subr.bf16.mxu1 %v450_v1 }
  0x13   :  { %378 = vmatpush3.bf16.msra.mxu0 %v435_v14 }
  0x14   :  { %409 = vmatpush3.bf16.msra.mxu1 %v436_v15  ;;  %379 = vmatprep.subr.bf16.mxu0 %v437_v16 }
  0x15   :  { %410 = vmatprep.subr.bf16.mxu1 %v450_v1 }
  0x17   :  { %380 = vmatpush3.bf16.msra.mxu0 %v438_v17 }
  0x18   :  { %411 = vmatpush3.bf16.msra.mxu1 %v439_v18  ;;  %381 = vmatprep.subr.bf16.mxu0 %v440_v19 }
  0x19   :  { %412 = vmatprep.subr.bf16.mxu1 %v450_v1 }
  0x1b   :  { %382 = vmatpush3.bf16.msra.mxu0 %v441_v20 }
  0x1c   :  { %413 = vmatpush3.bf16.msra.mxu1 %v442_v21  ;;  %383 = vmatprep.subr.bf16.mxu0 %v443_v22 }
  0x1d   :  { %414 = vmatprep.subr.bf16.mxu1 %v450_v1 }
  0x1f   :  { %384 = vmatpush3.bf16.msra.mxu0 %v444_v24 }
  0x20   :  { %415 = vmatpush3.bf16.msra.mxu1 %v445_v25 }
  0x22   :  { %268 = vmatmul.mubr.bf16.vlgmr.msra.gmra.mrb[0].mxu0 %v446_v26 }
  0x23   :  { %417 = vmatmul.mubr.bf16.vlgmr.msra.gmra.mrb[0].mxu1 %v449_v27 }
  0xf5   :  { %v385_v28 = vpop.f32.mrb[0].mxu0 }
  0xf6   :  { %v310_v29 = vpop.f32.mrb[0].mxu1  ;;  %v386_v30 = vpop.f32.mrb[1].mxu0 }
  0xf7   :  { %v387_v31 = vadd.f32 %v386_v30, %v385_v28  ;;  %v418_v32 = vpop.f32.mrb[1].mxu1  ;;  %v388_v33 = vpop.f32.mrb[2].mxu0 }
  0xf8   :  { %v313_v35 = vpop.f32.mrb[2].mxu1  ;;  %v389_v36 = vpop.f32.mrb[3].mxu0 }
  0xf9   :  { %v311_v37 = vadd.f32 %v387_v31, %v310_v29  ;;  %v390_v38 = vadd.f32 %v389_v36, %v388_v33  ;;  %v419_v39 = vpop.f32.mrb[3].mxu1 }
  0xfb   :  { %v333_v40 = vadd.f32 %v368_v34, %v311_v37  ;;  %v314_v41 = vadd.f32 %v390_v38, %v313_v35 }
  0xfd   :  { %335 = vst [vmem:[%s565_s3] sm:$0xff] %v333_v40  ;;  %v334_v42 = vadd.f32 %v368_v34, %v314_v41 }
  0xff   :  { %336 = vst [vmem:[%s565_s3 + $0x8] sm:$0xff] %v334_v42 }

// kernel: _lambda_.23
= control target key start
LH: loop header
LB: loop body
LE: loop exit
PB: predicated region body
PF: predicated region fallthrough
CT: control target
= control target key end

     0   :  { %v197_v0 = vmov 0.0   ;;  %vm198_vm0 = vmmov 0   ;;  %s247_s1 = inlined_call_operand.vmem [shape: bf16[128,128], index: 1, kind: input, shape index: {}]   ;;  %s248_s0 = inlined_call_operand.vmem [shape: bf16[16,128], index: 0, kind: input, shape index: {}]   ;;  %s249_s2 = inlined_call_operand.vmem [shape: f32[16,128], index: 2, kind: output, shape index: {}]  }
   0x1   :  { %166 = vmatprep.subr.bf16.mxu0 %v197_v0  ;;  %v188_v1 = vld [vmem:[%s247_s1] sm:$0xff]   ;;  %182 = vmatprep.mubr.msk.bf16.mxu0 %vm198_vm0, %v197_v0  ;;  %v189_v2 = vld [vmem:[%s247_s1 + $0x8] sm:$0xff]   ;;  %v190_v3 = vld [vmem:[%s247_s1 + $0x10] sm:$0xff]  }
   0x2   :  { %167 = vmatpush3.bf16.msra.mxu0 %v188_v1  ;;  %v191_v4 = vld [vmem:[%s247_s1 + $0x18] sm:$0xff]   ;;  %v192_v5 = vld [vmem:[%s247_s1 + $0x20] sm:$0xff]   ;;  %v193_v6 = vld [vmem:[%s247_s1 + $0x28] sm:$0xff]  }
   0x3   :  { %168 = vmatprep.subr.bf16.mxu0 %v197_v0  ;;  %v194_v7 = vld [vmem:[%s247_s1 + $0x30] sm:$0xff]   ;;  %v195_v8 = vld [vmem:[%s247_s1 + $0x38] sm:$0xff]   ;;  %v196_v9 = vld [vmem:[%s248_s0] sm:$0xff]  }
   0x6   :  { %169 = vmatpush3.bf16.msra.mxu0 %v189_v2 }
   0x7   :  { %170 = vmatprep.subr.bf16.mxu0 %v197_v0 }
   0xa   :  { %171 = vmatpush3.bf16.msra.mxu0 %v190_v3 }
   0xb   :  { %172 = vmatprep.subr.bf16.mxu0 %v197_v0 }
   0xe   :  { %173 = vmatpush3.bf16.msra.mxu0 %v191_v4 }
   0xf   :  { %174 = vmatprep.subr.bf16.mxu0 %v197_v0 }
  0x12   :  { %175 = vmatpush3.bf16.msra.mxu0 %v192_v5 }
  0x13   :  { %176 = vmatprep.subr.bf16.mxu0 %v197_v0 }
  0x16   :  { %177 = vmatpush3.bf16.msra.mxu0 %v193_v6 }
  0x17   :  { %178 = vmatprep.subr.bf16.mxu0 %v197_v0 }
  0x1a   :  { %179 = vmatpush3.bf16.msra.mxu0 %v194_v7 }
  0x1b   :  { %180 = vmatprep.subr.bf16.mxu0 %v197_v0 }
  0x1e   :  { %181 = vmatpush3.bf16.msra.mxu0 %v195_v8 }
  0x21   :  { %183 = vmatmul.mubr.bf16.vlgmr.msra.gmra.mrb[0].mxu0 %v196_v9 }
  0xf4   :  { %v126_v10 = vpop.f32.mrb[0].mxu0 }
  0xf5   :  { %142 = vst [vmem:[%s249_s2] sm:$0xff] %v126_v10  ;;  %v184_v11 = vpop.f32.mrb[1].mxu0 }
  0xf6   :  { %v129_v12 = vpop.f32.mrb[2].mxu0 }
  0xf7   :  { %143 = vst [vmem:[%s249_s2 + $0x8] sm:$0xff] %v129_v12  ;;  %v185_v13 = vpop.f32.mrb[3].mxu0 }

// kernel: _lambda_.22
= control target key start
LH: loop header
LB: loop body
LE: loop exit
PB: predicated region body
PF: predicated region fallthrough
CT: control target
= control target key end

     0   :  { %v214_v0 = vmov 0.0   ;;  %vm215_vm0 = vmmov 0   ;;  %s272_s1 = inlined_call_operand.vmem [shape: bf16[128,128], index: 1, kind: input, shape index: {}]   ;;  %s273_s0 = inlined_call_operand.vmem [shape: bf16[16,128], index: 0, kind: input, shape index: {}]   ;;  %s274_s2 = inlined_call_operand.vmem [shape: f32[1,128], index: 2, kind: input, shape index: {}]   ;;  %s275_s3 = inlined_call_operand.vmem [shape: f32[16,128], index: 3, kind: output, shape index: {}]  }
   0x1   :  { %183 = vmatprep.subr.bf16.mxu0 %v214_v0  ;;  %v205_v1 = vld [vmem:[%s272_s1] sm:$0xff]   ;;  %199 = vmatprep.mubr.msk.bf16.mxu0 %vm215_vm0, %v214_v0  ;;  %v206_v2 = vld [vmem:[%s272_s1 + $0x8] sm:$0xff]   ;;  %v207_v3 = vld [vmem:[%s272_s1 + $0x10] sm:$0xff]  }
   0x2   :  { %184 = vmatpush3.bf16.msra.mxu0 %v205_v1  ;;  %v208_v4 = vld [vmem:[%s272_s1 + $0x18] sm:$0xff]   ;;  %v209_v5 = vld [vmem:[%s272_s1 + $0x20] sm:$0xff]   ;;  %v210_v6 = vld [vmem:[%s272_s1 + $0x28] sm:$0xff]  }
   0x3   :  { %185 = vmatprep.subr.bf16.mxu0 %v214_v0  ;;  %v211_v7 = vld [vmem:[%s272_s1 + $0x30] sm:$0xff]   ;;  %v212_v8 = vld [vmem:[%s272_s1 + $0x38] sm:$0xff]   ;;  %v213_v9 = vld [vmem:[%s273_s0] sm:$0xff]  }
   0x4   :  { %v173_v10 = vld [vmem:[%s274_s2] ss:$0 sm:$0xff] }
   0x6   :  { %186 = vmatpush3.bf16.msra.mxu0 %v206_v2 }
   0x7   :  { %187 = vmatprep.subr.bf16.mxu0 %v214_v0 }
   0xa   :  { %188 = vmatpush3.bf16.msra.mxu0 %v207_v3 }
   0xb   :  { %189 = vmatprep.subr.bf16.mxu0 %v214_v0 }
   0xe   :  { %190 = vmatpush3.bf16.msra.mxu0 %v208_v4 }
   0xf   :  { %191 = vmatprep.subr.bf16.mxu0 %v214_v0 }
  0x12   :  { %192 = vmatpush3.bf16.msra.mxu0 %v209_v5 }
  0x13   :  { %193 = vmatprep.subr.bf16.mxu0 %v214_v0 }
  0x16   :  { %194 = vmatpush3.bf16.msra.mxu0 %v210_v6 }
  0x17   :  { %195 = vmatprep.subr.bf16.mxu0 %v214_v0 }
  0x1a   :  { %196 = vmatpush3.bf16.msra.mxu0 %v211_v7 }
  0x1b   :  { %197 = vmatprep.subr.bf16.mxu0 %v214_v0 }
  0x1e   :  { %198 = vmatpush3.bf16.msra.mxu0 %v212_v8 }
  0x21   :  { %200 = vmatmul.mubr.bf16.vlgmr.msra.gmra.mrb[0].mxu0 %v213_v9 }
  0xf4   :  { %v129_v11 = vpop.f32.mrb[0].mxu0 }
  0xf5   :  { %v152_v12 = vadd.f32 %v173_v10, %v129_v11  ;;  %v201_v13 = vpop.f32.mrb[1].mxu0 }
  0xf6   :  { %v132_v14 = vpop.f32.mrb[2].mxu0 }
  0xf7   :  { %v154_v15 = vmul.f32 0.2, %v152_v12  ;;  %v153_v16 = vadd.f32 %v173_v10, %v132_v14  ;;  %v202_v17 = vpop.f32.mrb[3].mxu0 }
  0xf9   :  { %v156_v18 = vmax.f32 %v152_v12, %v154_v15  ;;  %v155_v19 = vmul.f32 0.2, %v153_v16 }
  0xfb   :  { %158 = vst [vmem:[%s275_s3] sm:$0xff] %v156_v18  ;;  %v157_v20 = vmax.f32 %v153_v16, %v155_v19 }
  0xfd   :  { %159 = vst [vmem:[%s275_s3 + $0x8] sm:$0xff] %v157_v20 }

// kernel: _lambda_.24
= control target key start
LH: loop header
LB: loop body
LE: loop exit
PB: predicated region body
PF: predicated region fallthrough
CT: control target
= control target key end

     0   :  { %s717_s12 = smov 0   ;;  %s719_s13 = smov 0   ;;  %s782_s0 = inlined_call_operand.vmem [shape: bf16[2,16,128], index: 0, kind: input, shape index: {}]   ;;  %s783_s1 = inlined_call_operand.vmem [shape: bf16[128,128], index: 1, kind: input, shape index: {}]   ;;  %s784_s2 = inlined_call_operand.vmem [shape: f32[2,1,128], index: 2, kind: input, shape index: {}]   ;;  %s785_s3 = inlined_call_operand.vmem [shape: f32[2,16,128], index: 3, kind: output, shape index: {}]  }
   0x1   :  { %s721_s14 = smov 0  }
   0x2 LB: > { %s39_s15 = sadd.s32 1, %s689_s13  ;;  %p588_p0 = scmp.ge.s32.totalorder %s693_s14, 1  ;;  %s693_s14 = sphi %s721_s14, %s13_s14   ;;  %s689_s13 = sphi %s719_s13, %s787_s13   ;;  %s685_s12 = sphi %s717_s12, %s786_s12  }
   0x3   : > { %p41_p1 = scmp.ge.s32.totalorder %s39_s15, 2  ;;  %p208_p2 = scmp.lt.s32.totalorder %s693_s14, 3 }
   0x5   : > { %s789_s15 = smov (%p41_p1, %s39_s15), 0  ;;  %p209_p3 = pnand %p588_p0, %p208_p2 }
   0x6   : > { %v662_v0 = vld [vmem:[%s783_s1] sm:$0xff] (!%p209_p3)   ;;  %v695_v1 = vmov (!%p209_p3), 0.0   ;;  %v663_v2 = vld [vmem:[%s783_s1 + $0x8] sm:$0xff] (!%p209_p3)   ;;  %vm696_vm0 = vmmov (!%p209_p3), 0   ;;  %p261_p4 = scmp.lt.s32.totalorder (!%p209_p3), %s685_s12, 1  ;;  %v664_v3 = vld [vmem:[%s783_s1 + $0x10] sm:$0xff] (!%p209_p3)  }
   0x7   : > { %212 = sbr.rel (%p209_p3) target bundleno = 260 (0x104), region = 32  ;;  %616 = vmatprep.subr.bf16.mxu0 (!%p209_p3), %v695_v1  ;;  %632 = vmatprep.mubr.msk.bf16.mxu0 (!%p209_p3), %vm696_vm0, %v695_v1  ;;  %v665_v4 = vld [vmem:[%s783_s1 + $0x18] sm:$0xff] (!%p209_p3)   ;;  %v666_v5 = vld [vmem:[%s783_s1 + $0x20] sm:$0xff] (!%p209_p3)   ;;  %v667_v6 = vld [vmem:[%s783_s1 + $0x28] sm:$0xff] (!%p209_p3)  }
   0x8   : > { %617 = vmatpush3.bf16.msra.mxu0 (!%p209_p3), %v662_v0  ;;  %v668_v7 = vld [vmem:[%s783_s1 + $0x30] sm:$0xff] (!%p209_p3)   ;;  %v669_v8 = vld [vmem:[%s783_s1 + $0x38] sm:$0xff] (!%p209_p3)  }
   0x9   : > { %618 = vmatprep.subr.bf16.mxu0 (!%p209_p3), %v695_v1 }
   0xc   : > { %619 = vmatpush3.bf16.msra.mxu0 (!%p209_p3), %v663_v2 }
   0xd   : > { %620 = vmatprep.subr.bf16.mxu0 (!%p209_p3), %v695_v1 }
   0xe   : > { %s791_s12 = smov (!%p261_p4, %s685_s12), 1 }
   0xf   : > { %s605_s22 = sshll.u32 %s791_s12, 3  ;;  %s287_s11 = scalar_lea.vmem %s784_s2, %s791_s12 }
  0x10   : > { %s271_s25 = scalar_lea.vmem %s782_s0, %s605_s22  ;;  %621 = vmatpush3.bf16.msra.mxu0 %v664_v3  ;;  %v602_v10 = vld [vmem:[%s287_s11] ss:$0 sm:$0xff]  ;;  %s606_s16 = sshll.u32 %s791_s12, 4 }
  0x11   : > { %622 = vmatprep.subr.bf16.mxu0 %v695_v1  ;;  %v670_v9 = vld [vmem:[%s271_s25] sm:$0xff]   ;;  %s299_s19 = scalar_lea.vmem %s785_s3, %s606_s16 }
  0x14   : > { %623 = vmatpush3.bf16.msra.mxu0 %v665_v4 }
  0x15   : > { %624 = vmatprep.subr.bf16.mxu0 %v695_v1 }
  0x18   : > { %625 = vmatpush3.bf16.msra.mxu0 %v666_v5 }
  0x19   : > { %626 = vmatprep.subr.bf16.mxu0 %v695_v1 }
  0x1c   : > { %627 = vmatpush3.bf16.msra.mxu0 %v667_v6 }
  0x1d   : > { %628 = vmatprep.subr.bf16.mxu0 %v695_v1 }
  0x20   : > { %629 = vmatpush3.bf16.msra.mxu0 %v668_v7 }
  0x21   : > { %630 = vmatprep.subr.bf16.mxu0 %v695_v1 }
  0x24   : > { %631 = vmatpush3.bf16.msra.mxu0 %v669_v8 }
  0x27   : > { %633 = vmatmul.mubr.bf16.vlgmr.msra.gmra.mrb[0].mxu0 %v670_v9 }
  0xfa   : > { %v416_v11 = vpop.f32.mrb[0].mxu0 }
  0xfb   : > { %v439_v12 = vadd.f32 %v602_v10, %v416_v11  ;;  %v634_v13 = vpop.f32.mrb[1].mxu0 }
  0xfc   : > { %v419_v14 = vpop.f32.mrb[2].mxu0 }
  0xfd   : > { %v441_v15 = vmul.f32 0.2, %v439_v12  ;;  %v440_v16 = vadd.f32 %v602_v10, %v419_v14  ;;  %v635_v17 = vpop.f32.mrb[3].mxu0 }
  0xff   : > { %v443_v18 = vmax.f32 %v439_v12, %v441_v15  ;;  %v442_v19 = vmul.f32 0.2, %v440_v16 }
 0x101   : > { %445 = vst [vmem:[%s299_s19] sm:$0xff] %v443_v18  ;;  %v444_v20 = vmax.f32 %v440_v16, %v442_v19 }
 0x103   : > { %446 = vst [vmem:[%s299_s19 + $0x8] sm:$0xff] %v444_v20 }
 0x104 PF: > { %s13_s14 = sadd.s32 1, %s693_s14   ;;  %s786_s12 = smov %s689_s13 }
 0x105   : > { %p10_p5 = scmp.ge.s32.totalorder %s13_s14, 4   ;;  %s787_s13 = smov %s789_s15 }
 0x107   :  { %12 = sbr.rel (!%p10_p5) target bundleno = 2 (0x2), region = 76 }

// kernel: _lambda_.27
= control target key start
LH: loop header
LB: loop body
LE: loop exit
PB: predicated region body
PF: predicated region fallthrough
CT: control target
= control target key end

     0   :  { %v232_v0 = vmov 0.0   ;;  %vm233_vm0 = vmmov 0   ;;  %s290_s1 = inlined_call_operand.vmem [shape: bf16[128,128], index: 1, kind: input, shape index: {}]   ;;  %s291_s0 = inlined_call_operand.vmem [shape: bf16[16,128], index: 0, kind: input, shape index: {}]   ;;  %s292_s2 = inlined_call_operand.vmem [shape: f32[1,128], index: 2, kind: input, shape index: {}]   ;;  %s293_s3 = inlined_call_operand.vmem [shape: f32[16,128], index: 3, kind: output, shape index: {}]  }
   0x1   :  { %193 = vmatprep.subr.bf16.mxu0 %v232_v0  ;;  %v215_v1 = vld [vmem:[%s290_s1] sm:$0xff]   ;;  %209 = vmatprep.mubr.msk.bf16.mxu0 %vm233_vm0, %v232_v0  ;;  %v216_v2 = vld [vmem:[%s290_s1 + $0x8] sm:$0xff]   ;;  %v217_v3 = vld [vmem:[%s290_s1 + $0x10] sm:$0xff]  }
   0x2   :  { %194 = vmatpush3.bf16.msra.mxu0 %v215_v1  ;;  %v218_v4 = vld [vmem:[%s290_s1 + $0x18] sm:$0xff]   ;;  %v219_v5 = vld [vmem:[%s290_s1 + $0x20] sm:$0xff]   ;;  %v220_v6 = vld [vmem:[%s290_s1 + $0x28] sm:$0xff]  }
   0x3   :  { %195 = vmatprep.subr.bf16.mxu0 %v232_v0  ;;  %v221_v7 = vld [vmem:[%s290_s1 + $0x30] sm:$0xff]   ;;  %v222_v8 = vld [vmem:[%s290_s1 + $0x38] sm:$0xff]   ;;  %v223_v9 = vld [vmem:[%s291_s0] sm:$0xff]  }
   0x4   :  { %v181_v10 = vld [vmem:[%s292_s2] ss:$0 sm:$0xff] }
   0x6   :  { %196 = vmatpush3.bf16.msra.mxu0 %v216_v2 }
   0x7   :  { %197 = vmatprep.subr.bf16.mxu0 %v232_v0 }
   0xa   :  { %198 = vmatpush3.bf16.msra.mxu0 %v217_v3 }
   0xb   :  { %199 = vmatprep.subr.bf16.mxu0 %v232_v0 }
   0xe   :  { %200 = vmatpush3.bf16.msra.mxu0 %v218_v4 }
   0xf   :  { %201 = vmatprep.subr.bf16.mxu0 %v232_v0 }
  0x12   :  { %202 = vmatpush3.bf16.msra.mxu0 %v219_v5 }
  0x13   :  { %203 = vmatprep.subr.bf16.mxu0 %v232_v0 }
  0x16   :  { %204 = vmatpush3.bf16.msra.mxu0 %v220_v6 }
  0x17   :  { %205 = vmatprep.subr.bf16.mxu0 %v232_v0 }
  0x1a   :  { %206 = vmatpush3.bf16.msra.mxu0 %v221_v7 }
  0x1b   :  { %207 = vmatprep.subr.bf16.mxu0 %v232_v0 }
  0x1e   :  { %208 = vmatpush3.bf16.msra.mxu0 %v222_v8 }
  0x21   :  { %210 = vmatmul.mubr.bf16.vlgmr.msra.gmra.mrb[0].mxu0 %v223_v9 }
  0xf4   :  { %v129_v11 = vpop.f32.mrb[0].mxu0 }
  0xf5   :  { %v152_v12 = vadd.f32 %v181_v10, %v129_v11  ;;  %v211_v13 = vpop.f32.mrb[1].mxu0 }
  0xf6   :  { %v132_v14 = vpop.f32.mrb[2].mxu0 }
  0xf7   :  { %v182_v15 = vmul.f32 -1.442695, %v152_v12  ;;  %v153_v16 = vadd.f32 %v181_v10, %v132_v14  ;;  %v212_v17 = vpop.f32.mrb[3].mxu0 }
  0xf9   :  { %224 = vpow2.f32 %v182_v15  ;;  %v183_v18 = vmul.f32 -1.442695, %v153_v16 }
  0xfb   :  { %226 = vpow2.f32 %v183_v18 }
 0x103   :  { %v225_v19 = vpop.eup %224 }
 0x104   :  { %v160_v20 = vadd.f32 1.0, %v225_v19 }
 0x105   :  { %v227_v21 = vpop.eup %226 }
 0x106   :  { %228 = vrcp.f32 %v160_v20  ;;  %v161_v22 = vadd.f32 1.0, %v227_v21 }
 0x108   :  { %230 = vrcp.f32 %v161_v22 }
 0x110   :  { %v229_v23 = vpop.eup %228 }
 0x111   :  { %166 = vst [vmem:[%s293_s3] sm:$0xff] %v229_v23 }
 0x112   :  { %v231_v24 = vpop.eup %230 }
 0x113   :  { %167 = vst [vmem:[%s293_s3 + $0x8] sm:$0xff] %v231_v24 }

</bundles_post_ra>
